<compile_context>
chip_gen: v7x
topology: tpu7x:2x2x1
jax: 0.10.0
libtpu: 0.0.40
codegen_flags: <defaults>
</compile_context>

<pallas_src>
import numpy as np
import jax
import jax.numpy as jnp
from jax.experimental import pallas as pl
from jax.experimental.pallas import tpu as pltpu

# ----------------------------- configuration ---------------------------------
PATCH = 4            # space-to-depth patch size for the backbone stand-in
C_FEAT = 64          # backbone output channels (stand-in for ResNet-101's 2048)
FEAT_SIZE = 14       # EncoderCNN.feat_size  (AdaptiveAvgPool2d target)
LANE = 128           # TPU lane width; all channel dims padded to this
POOL_OUT = FEAT_SIZE * FEAT_SIZE        # 196
POOL_OUT_PAD = 224                      # 196 rounded up to a multiple of 8 (sublanes)
BT = 8               # images per grid step (batch tile)


def adaptive_avg_pool_matrix(in_size: int, out_size: int) -> np.ndarray:
    """Exact PyTorch AdaptiveAvgPool1d averaging matrix, shape (out_size, in_size)."""
    P = np.zeros((out_size, in_size), dtype=np.float32)
    for i in range(out_size):
        start = (i * in_size) // out_size
        end = -((-(i + 1) * in_size) // out_size)        # ceil((i+1)*in/out)
        P[i, start:end] = 1.0 / float(end - start)
    return P


# ------------------------------ Pallas kernel --------------------------------
def encoder_kernel(x_ref, w1_ref, b1_ref, w2_ref, b2_ref, p2_ref, o_ref):
    """One Bt-image block: two pointwise conv/ReLU layers + adaptive avg pool.

    x_ref : (Bt, S, 128)    bf16  flattened 4x4 patches, spatial-major, zero-padded lanes
    w1/w2 : (128, 128)      bf16  zero-padded pointwise weights
    b1/b2 : (1, 128)        f32   zero-padded biases
    p2_ref: (224, S)        bf16  kron(Ph, Pw) pooling matrix, rows padded 196->224
    o_ref : (Bt, 224, 128)  f32
    """
    Bt, S, Cp = x_ref.shape

    x = x_ref[...].reshape(Bt * S, Cp)                                  # bf16
    h = jnp.dot(x, w1_ref[...], preferred_element_type=jnp.float32) + b1_ref[...]
    h = jnp.maximum(h, 0.0).astype(jnp.bfloat16)
    h = jnp.dot(h, w2_ref[...], preferred_element_type=jnp.float32) + b2_ref[...]
    h = jnp.maximum(h, 0.0).astype(jnp.bfloat16)                        # (Bt*S, 128)

    p2 = p2_ref[...]                                                    # (224, S) bf16
    for b in range(Bt):                                                 # Bt is small, static
        o_ref[b] = jnp.dot(p2, h[b * S:(b + 1) * S, :],
                           preferred_element_type=jnp.float32)          # (224, 128)


# ------------------------------ wrapper ---------------------------------------
@jax.jit
def encoder_cnn_forward(images, params):
    """images: (B, C_in, H, W) float32 NCHW -> (B, 14, 14, C_FEAT) NHWC."""
    B, Cin, H, W = images.shape
    assert H % PATCH == 0 and W % PATCH == 0
    Hf, Wf = H // PATCH, W // PATCH
    S = Hf * Wf
    Cin_p = Cin * PATCH * PATCH
    assert Cin_p <= LANE and S % 8 == 0

    # --- glue (fused under jit): space-to-depth patchify, pad lanes, cast bf16 ---
    x = images.reshape(B, Cin, Hf, PATCH, Wf, PATCH)
    x = x.transpose(0, 2, 4, 1, 3, 5).reshape(B, S, Cin_p)              # row = h*Wf + w
    x = jnp.pad(x, ((0, 0), (0, 0), (0, LANE - Cin_p))).astype(jnp.bfloat16)

    Bt = min(BT, B)
    Bpad = -(-B // Bt) * Bt
    if Bpad != B:
        x = jnp.pad(x, ((0, Bpad - B), (0, 0), (0, 0)))

    # --- exact AdaptiveAvgPool2d((14,14)) matrix, baked as a compile-time constant ---
    ph = adaptive_avg_pool_matrix(Hf, FEAT_SIZE)
    pw = adaptive_avg_pool_matrix(Wf, FEAT_SIZE)
    p2_np = np.zeros((POOL_OUT_PAD, S), dtype=np.float32)
    p2_np[:POOL_OUT] = np.kron(ph, pw)
    p2 = jnp.asarray(p2_np, dtype=jnp.bfloat16)                          # (224, S)

    out = pl.pallas_call(
        encoder_kernel,
        out_shape=jax.ShapeDtypeStruct((Bpad, POOL_OUT_PAD, LANE), jnp.float32),
        grid=(Bpad // Bt,),
        in_specs=[
            pl.BlockSpec((Bt, S, LANE), lambda i: (i, 0, 0)),
            pl.BlockSpec((LANE, LANE), lambda i: (0, 0)),
            pl.BlockSpec((1, LANE), lambda i: (0, 0)),
            pl.BlockSpec((LANE, LANE), lambda i: (0, 0)),
            pl.BlockSpec((1, LANE), lambda i: (0, 0)),
            pl.BlockSpec((POOL_OUT_PAD, S), lambda i: (0, 0)),
        ],
        out_specs=pl.BlockSpec((Bt, POOL_OUT_PAD, LANE), lambda i: (i, 0, 0)),
        compiler_params=pltpu.CompilerParams(dimension_semantics=("parallel",)),
    )(x, params["w1"], params["b1"], params["w2"], params["b2"], p2)

    # strip padding; (B, 196, C) -> (B, 14, 14, C)  == feat_resnet.permute(0, 2, 3, 1)
    out = out[:B, :POOL_OUT, :C_FEAT]
    return out.reshape(B, FEAT_SIZE, FEAT_SIZE, C_FEAT)


def init_params(key, cin):
    """Zero-padded, bf16 weights so the kernel is lane-dense and bit-equivalent."""
    cin_p = cin * PATCH * PATCH
    k1, k2 = jax.random.split(key, 2)
    w1 = jax.random.normal(k1, (cin_p, C_FEAT), jnp.float32) / np.sqrt(cin_p)
    w2 = jax.random.normal(k2, (C_FEAT, C_FEAT), jnp.float32) / np.sqrt(C_FEAT)
    w1p = jnp.zeros((LANE, LANE), jnp.float32).at[:cin_p, :C_FEAT].set(w1)
    w2p = jnp.zeros((LANE, LANE), jnp.float32).at[:C_FEAT, :C_FEAT].set(w2)
    return {
        "w1": w1p.astype(jnp.bfloat16),
        "b1": jnp.zeros((1, LANE), jnp.float32),
        "w2": w2p.astype(jnp.bfloat16),
        "b2": jnp.zeros((1, LANE), jnp.float32),
    }


# ------------------------------ reference (pure JAX, f32) ----------------------
def reference_forward(images, params):
    B, Cin, H, W = images.shape
    Hf, Wf = H // PATCH, W // PATCH
    S = Hf * Wf
    cin_p = Cin * PATCH * PATCH
    x = images.reshape(B, Cin, Hf, PATCH, Wf, PATCH)
    x = x.transpose(0, 2, 4, 1, 3, 5).reshape(B, S, cin_p)
    w1 = params["w1"][:cin_p, :C_FEAT].astype(jnp.float32)
    w2 = params["w2"][:C_FEAT, :C_FEAT].astype(jnp.float32)
    b1 = params["b1"][:, :C_FEAT]
    b2 = params["b2"][:, :C_FEAT]
    h = jnp.maximum(x @ w1 + b1, 0.0)
    h = jnp.maximum(h @ w2 + b2, 0.0)
    p2 = jnp.asarray(np.kron(adaptive_avg_pool_matrix(Hf, FEAT_SIZE),
                             adaptive_avg_pool_matrix(Wf, FEAT_SIZE)))
    pooled = jnp.einsum("ps,bsc->bpc", p2, h)
    return pooled.reshape(B, FEAT_SIZE, FEAT_SIZE, C_FEAT)


if __name__ == "__main__":
    key = jax.random.PRNGKey(0)
    k_img, k_par = jax.random.split(key)

    # Small COCO-like images: (B=2, C=3, H=64, W=64) NCHW.
    images = jax.random.normal(k_img, (2, 3, 64, 64), jnp.float32)
    params = init_params(k_par, cin=3)

    out = jax.block_until_ready(encoder_cnn_forward(images, params))
    ref = jax.block_until_ready(reference_forward(images, params))

    assert out.shape == (2, FEAT_SIZE, FEAT_SIZE, C_FEAT), out.shape
    assert jnp.all(jnp.isfinite(out))
    np.testing.assert_allclose(np.asarray(out), np.asarray(ref), rtol=3e-2, atol=3e-2)
    print("KERNEL_OK")
</pallas_src>

<mosaic_0001>
module attributes {stable_mosaic.version = 11 : i64} {
  func.func @encoder_kernel(%arg0: i32, %arg1: memref<2x256x128xbf16, #tpu.memory_space<vmem>>, %arg2: memref<128x128xbf16, #tpu.memory_space<vmem>>, %arg3: memref<1x128xf32, #tpu.memory_space<vmem>>, %arg4: memref<128x128xbf16, #tpu.memory_space<vmem>>, %arg5: memref<1x128xf32, #tpu.memory_space<vmem>>, %arg6: memref<224x256xbf16, #tpu.memory_space<vmem>>, %arg7: memref<2x224x128xf32, #tpu.memory_space<vmem>>) attributes {dimension_semantics = [#tpu.dimension_semantics<parallel>], iteration_bounds = array<i64: 1>, scalar_prefetch = 0 : i64, scratch_operands = 0 : i64, tpu.core_type = #tpu.core_type<tc>, window_params = [{transform_indices = @transform_0, window_bounds = array<i64: 2, 256, 128>}, {pipeline_mode = #tpu.pipeline_mode<synchronous>, transform_indices = @transform_1, window_bounds = array<i64: 128, 128>}, {pipeline_mode = #tpu.pipeline_mode<synchronous>, transform_indices = @transform_2, window_bounds = array<i64: 1, 128>}, {pipeline_mode = #tpu.pipeline_mode<synchronous>, transform_indices = @transform_3, window_bounds = array<i64: 128, 128>}, {pipeline_mode = #tpu.pipeline_mode<synchronous>, transform_indices = @transform_4, window_bounds = array<i64: 1, 128>}, {pipeline_mode = #tpu.pipeline_mode<synchronous>, transform_indices = @transform_5, window_bounds = array<i64: 224, 256>}, {transform_indices = @transform_6, window_bounds = array<i64: 2, 224, 128>}]} {
    %c0 = arith.constant 0 : index
    %c0_0 = arith.constant 0 : index
    %c0_1 = arith.constant 0 : index
    %0 = vector.load %arg1[%c0, %c0_0, %c0_1] : memref<2x256x128xbf16, #tpu.memory_space<vmem>>, vector<2x256x128xbf16>
    %1 = vector.shape_cast %0 : vector<2x256x128xbf16> to vector<512x128xbf16>
    %c0_2 = arith.constant 0 : index
    %c0_3 = arith.constant 0 : index
    %2 = vector.load %arg2[%c0_2, %c0_3] : memref<128x128xbf16, #tpu.memory_space<vmem>>, vector<128x128xbf16>
    %cst = arith.constant dense<0.000000e+00> : vector<512x128xf32>
    %3 = tpu.matmul %1, %2, %cst {dimension_numbers = #tpu.dot_dimension_numbers<[1], [0], [0], [1], [0, 0, 1, 1], [], []>} : vector<512x128xbf16>, vector<128x128xbf16>, vector<512x128xf32> -> vector<512x128xf32>
    %c0_4 = arith.constant 0 : index
    %c0_5 = arith.constant 0 : index
    %4 = vector.load %arg3[%c0_4, %c0_5] : memref<1x128xf32, #tpu.memory_space<vmem>>, vector<1x128xf32>
    %5 = vector.broadcast %4 : vector<1x128xf32> to vector<512x128xf32>
    %6 = arith.addf %3, %5 : vector<512x128xf32>
    %cst_6 = arith.constant 0.000000e+00 : f32
    %7 = vector.broadcast %cst_6 : f32 to vector<512x128xf32>
    %8 = arith.maximumf %6, %7 : vector<512x128xf32>
    %9 = arith.truncf %8 : vector<512x128xf32> to vector<512x128xbf16>
    %c0_7 = arith.constant 0 : index
    %c0_8 = arith.constant 0 : index
    %10 = vector.load %arg4[%c0_7, %c0_8] : memref<128x128xbf16, #tpu.memory_space<vmem>>, vector<128x128xbf16>
    %cst_9 = arith.constant dense<0.000000e+00> : vector<512x128xf32>
    %11 = tpu.matmul %9, %10, %cst_9 {dimension_numbers = #tpu.dot_dimension_numbers<[1], [0], [0], [1], [0, 0, 1, 1], [], []>} : vector<512x128xbf16>, vector<128x128xbf16>, vector<512x128xf32> -> vector<512x128xf32>
    %c0_10 = arith.constant 0 : index
    %c0_11 = arith.constant 0 : index
    %12 = vector.load %arg5[%c0_10, %c0_11] : memref<1x128xf32, #tpu.memory_space<vmem>>, vector<1x128xf32>
    %13 = vector.broadcast %12 : vector<1x128xf32> to vector<512x128xf32>
    %14 = arith.addf %11, %13 : vector<512x128xf32>
    %cst_12 = arith.constant 0.000000e+00 : f32
    %15 = vector.broadcast %cst_12 : f32 to vector<512x128xf32>
    %16 = arith.maximumf %14, %15 : vector<512x128xf32>
    %17 = arith.truncf %16 : vector<512x128xf32> to vector<512x128xbf16>
    %c0_13 = arith.constant 0 : index
    %c0_14 = arith.constant 0 : index
    %18 = vector.load %arg6[%c0_13, %c0_14] : memref<224x256xbf16, #tpu.memory_space<vmem>>, vector<224x256xbf16>
    %19 = vector.extract_strided_slice %17 {offsets = [0, 0], sizes = [256, 128], strides = [1, 1]} : vector<512x128xbf16> to vector<256x128xbf16>
    %cst_15 = arith.constant dense<0.000000e+00> : vector<224x128xf32>
    %20 = tpu.matmul %18, %19, %cst_15 {dimension_numbers = #tpu.dot_dimension_numbers<[1], [0], [0], [1], [0, 0, 1, 1], [], []>} : vector<224x256xbf16>, vector<256x128xbf16>, vector<224x128xf32> -> vector<224x128xf32>
    %c0_16 = arith.constant 0 : index
    %c0_17 = arith.constant 0 : index
    %c0_18 = arith.constant 0 : index
    %21 = vector.load %arg7[%c0_16, %c0_17, %c0_18] : memref<2x224x128xf32, #tpu.memory_space<vmem>>, vector<1x224x128xf32>
    %22 = vector.shape_cast %21 : vector<1x224x128xf32> to vector<224x128xf32>
    %23 = vector.shape_cast %20 : vector<224x128xf32> to vector<1x224x128xf32>
    tpu.vector_store %arg7[%c0_16, %c0_17, %c0_18], %23 {strides = array<i32>} : memref<2x224x128xf32, #tpu.memory_space<vmem>>, vector<1x224x128xf32>,
    %24 = vector.extract_strided_slice %17 {offsets = [256, 0], sizes = [256, 128], strides = [1, 1]} : vector<512x128xbf16> to vector<256x128xbf16>
    %cst_19 = arith.constant dense<0.000000e+00> : vector<224x128xf32>
    %25 = tpu.matmul %18, %24, %cst_19 {dimension_numbers = #tpu.dot_dimension_numbers<[1], [0], [0], [1], [0, 0, 1, 1], [], []>} : vector<224x256xbf16>, vector<256x128xbf16>, vector<224x128xf32> -> vector<224x128xf32>
    %c1 = arith.constant 1 : index
    %c0_20 = arith.constant 0 : index
    %c0_21 = arith.constant 0 : index
    %26 = vector.load %arg7[%c1, %c0_20, %c0_21] : memref<2x224x128xf32, #tpu.memory_space<vmem>>, vector<1x224x128xf32>
    %27 = vector.shape_cast %26 : vector<1x224x128xf32> to vector<224x128xf32>
    %28 = vector.shape_cast %25 : vector<224x128xf32> to vector<1x224x128xf32>
    tpu.vector_store %arg7[%c1, %c0_20, %c0_21], %28 {strides = array<i32>} : memref<2x224x128xf32, #tpu.memory_space<vmem>>, vector<1x224x128xf32>,
    return
  }
  func.func @transform_0(%arg0: i32) -> (i32, i32, i32) {
    %c0_i32 = arith.constant 0 : i32
    %c0_i32_0 = arith.constant 0 : i32
    %c0_i32_1 = arith.constant 0 : i32
    return %arg0, %c0_i32, %c0_i32_0 : i32, i32, i32
  }
  func.func @transform_1(%arg0: i32) -> (i32, i32) {
    %c0_i32 = arith.constant 0 : i32
    %c0_i32_0 = arith.constant 0 : i32
    %c0_i32_1 = arith.constant 0 : i32
    return %c0_i32, %c0_i32_0 : i32, i32
  }
  func.func @transform_2(%arg0: i32) -> (i32, i32) {
    %c0_i32 = arith.constant 0 : i32
    %c0_i32_0 = arith.constant 0 : i32
    %c0_i32_1 = arith.constant 0 : i32
    return %c0_i32, %c0_i32_0 : i32, i32
  }
  func.func @transform_3(%arg0: i32) -> (i32, i32) {
    %c0_i32 = arith.constant 0 : i32
    %c0_i32_0 = arith.constant 0 : i32
    %c0_i32_1 = arith.constant 0 : i32
    return %c0_i32, %c0_i32_0 : i32, i32
  }
  func.func @transform_4(%arg0: i32) -> (i32, i32) {
    %c0_i32 = arith.constant 0 : i32
    %c0_i32_0 = arith.constant 0 : i32
    %c0_i32_1 = arith.constant 0 : i32
    return %c0_i32, %c0_i32_0 : i32, i32
  }
  func.func @transform_5(%arg0: i32) -> (i32, i32) {
    %c0_i32 = arith.constant 0 : i32
    %c0_i32_0 = arith.constant 0 : i32
    %c0_i32_1 = arith.constant 0 : i32
    return %c0_i32, %c0_i32_0 : i32, i32
  }
  func.func @transform_6(%arg0: i32) -> (i32, i32, i32) {
    %c0_i32 = arith.constant 0 : i32
    %c0_i32_0 = arith.constant 0 : i32
    %c0_i32_1 = arith.constant 0 : i32
    return %arg0, %c0_i32, %c0_i32_0 : i32, i32, i32
  }
}

</mosaic_0001>

<bundles_post_ra>
// kernel: encoder_cnn_forward.1
= control target key start
LH: loop header
LB: loop body
LE: loop exit
PB: predicated region body
PF: predicated region fallthrough
CT: control target
= control target key end

     0   :  { %s3020_s1 = inlined_call_operand.vmem [shape: bf16[128,128], index: 1, kind: input, shape index: {}]   ;;  %s3021_s0 = inlined_call_operand.vmem [shape: bf16[2,256,128], index: 0, kind: input, shape index: {}]   ;;  %s3022_s3 = inlined_call_operand.vmem [shape: bf16[128,128], index: 3, kind: input, shape index: {}]   ;;  %s3023_s2 = inlined_call_operand.vmem [shape: f32[1,128], index: 2, kind: input, shape index: {}]   ;;  %s3024_s4 = inlined_call_operand.vmem [shape: f32[1,128], index: 4, kind: input, shape index: {}]   ;;  %s3025_s5 = inlined_call_operand.vmem [shape: bf16[224,256], index: 5, kind: input, shape index: {}]   ;;  %s3026_s6 = inlined_call_operand.vmem [shape: f32[2,224,128], index: 6, kind: output, shape index: {}]  }
   0x1   :  { %v2257_v0 = vld [vmem:[%s3020_s1] sm:$0xff]   ;;  %v2258_v1 = vld [vmem:[%s3020_s1 + $0x8] sm:$0xff]   ;;  %v2259_v2 = vld [vmem:[%s3020_s1 + $0x10] sm:$0xff]  }
   0x2   :  { %2097 = vmatprep.subr.bf16.mxu0 %v2257_v0  ;;  %v2260_v3 = vld [vmem:[%s3020_s1 + $0x18] sm:$0xff]   ;;  %v2265_v4 = vld [vmem:[%s3021_s0] sm:$0xff]   ;;  %v2262_v6 = vld [vmem:[%s3020_s1 + $0x28] sm:$0xff]  }
   0x3   :  { %2098 = vmatpush3.bf16.msra.mxu0 %v2257_v0  ;;  %2113 = vmatprep.mubr.bf16.mxu0 %v2265_v4  ;;  %v2261_v5 = vld [vmem:[%s3020_s1 + $0x20] sm:$0xff]   ;;  %v2263_v7 = vld [vmem:[%s3020_s1 + $0x30] sm:$0xff]   ;;  %v2264_v8 = vld [vmem:[%s3020_s1 + $0x38] sm:$0xff]  }
   0x4   :  { %2099 = vmatprep.subr.bf16.mxu0 %v2258_v1  ;;  %v2266_v9 = vld [vmem:[%s3021_s0 + $0x8] sm:$0xff]   ;;  %v2267_v10 = vld [vmem:[%s3021_s0 + $0x10] sm:$0xff]   ;;  %v2268_v11 = vld [vmem:[%s3021_s0 + $0x18] sm:$0xff]  }
   0x5   :  { %v2269_v12 = vld [vmem:[%s3021_s0 + $0x20] sm:$0xff]   ;;  %v2298_v14 = vld [vmem:[%s3022_s3 + $0x8] sm:$0xff]   ;;  %v2299_v15 = vld [vmem:[%s3022_s3 + $0x10] sm:$0xff]  }
   0x6   :  { %v2297_v13 = vld [vmem:[%s3022_s3] sm:$0xff]   ;;  %v2270_v16 = vld [vmem:[%s3021_s0 + $0x28] sm:$0xff]   ;;  %v2271_v17 = vld [vmem:[%s3021_s0 + $0x30] sm:$0xff]  }
   0x7   :  { %2100 = vmatpush3.bf16.msra.mxu0 %v2258_v1  ;;  %2177 = vmatprep.subr.bf16.mxu1 %v2297_v13  ;;  %v2300_v18 = vld [vmem:[%s3022_s3 + $0x18] sm:$0xff]   ;;  %v2301_v19 = vld [vmem:[%s3022_s3 + $0x20] sm:$0xff]   ;;  %v2302_v22 = vld [vmem:[%s3022_s3 + $0x28] sm:$0xff]  }
   0x8   :  { %2101 = vmatprep.subr.bf16.mxu0 %v2259_v2  ;;  %2178 = vmatpush3.bf16.msra.mxu1 %v2297_v13  ;;  %v2272_v20 = vld [vmem:[%s3021_s0 + $0x38] sm:$0xff]   ;;  %v2273_v21 = vld [vmem:[%s3021_s0 + $0x40] sm:$0xff]   ;;  %v2274_v23 = vld [vmem:[%s3021_s0 + $0x48] sm:$0xff]  }
   0x9   :  { %2179 = vmatprep.subr.bf16.mxu1 %v2298_v14  ;;  %v2275_v24 = vld [vmem:[%s3021_s0 + $0x50] sm:$0xff]   ;;  %v2276_v25 = vld [vmem:[%s3021_s0 + $0x58] sm:$0xff]   ;;  %v2277_v26 = vld [vmem:[%s3021_s0 + $0x60] sm:$0xff]  }
   0xa   :  { %v2278_v27 = vld [vmem:[%s3021_s0 + $0x68] sm:$0xff]   ;;  %v2279_v28 = vld [vmem:[%s3021_s0 + $0x70] sm:$0xff]   ;;  %v2280_v29 = vld [vmem:[%s3021_s0 + $0x78] sm:$0xff]  }
   0xb   :  { %2102 = vmatpush3.bf16.msra.mxu0 %v2259_v2  ;;  %v2281_v30 = vld [vmem:[%s3021_s0 + $0x80] sm:$0xff]   ;;  %v2282_v31 = vld [vmem:[%s3021_s0 + $0x88] sm:$0xff]   ;;  %v2283_v32 = vld [vmem:[%s3021_s0 + $0x90] sm:$0xff]  }
   0xc   :  { %2103 = vmatprep.subr.bf16.mxu0 %v2260_v3  ;;  %2180 = vmatpush3.bf16.msra.mxu1 %v2298_v14  ;;  %v2284_v33 = vld [vmem:[%s3021_s0 + $0x98] sm:$0xff]   ;;  %v2285_v34 = vld [vmem:[%s3021_s0 + $0xa0] sm:$0xff]   ;;  %v2286_v35 = vld [vmem:[%s3021_s0 + $0xa8] sm:$0xff]  }
   0xd   :  { %2181 = vmatprep.subr.bf16.mxu1 %v2299_v15  ;;  %v2287_v36 = vld [vmem:[%s3021_s0 + $0xb0] sm:$0xff]   ;;  %v2288_v37 = vld [vmem:[%s3021_s0 + $0xb8] sm:$0xff]   ;;  %v2289_v39 = vld [vmem:[%s3021_s0 + $0xc0] sm:$0xff]  }
   0xe   :  { %v2303_v38 = vld [vmem:[%s3022_s3 + $0x30] sm:$0xff]   ;;  %v2304_v40 = vld [vmem:[%s3022_s3 + $0x38] sm:$0xff]   ;;  %v2290_v41 = vld [vmem:[%s3021_s0 + $0xc8] sm:$0xff]  }
   0xf   :  { %2104 = vmatpush3.bf16.msra.mxu0 %v2260_v3  ;;  %v2291_v42 = vld [vmem:[%s3021_s0 + $0xd0] sm:$0xff]   ;;  %v2292_v43 = vld [vmem:[%s3021_s0 + $0xd8] sm:$0xff]   ;;  %v2293_v44 = vld [vmem:[%s3021_s0 + $0xe0] sm:$0xff]  }
  0x10   :  { %2105 = vmatprep.subr.bf16.mxu0 %v2261_v5  ;;  %2182 = vmatpush3.bf16.msra.mxu1 %v2299_v15  ;;  %v2294_v45 = vld [vmem:[%s3021_s0 + $0xe8] sm:$0xff]   ;;  %v2295_v46 = vld [vmem:[%s3021_s0 + $0xf0] sm:$0xff]   ;;  %v2296_v47 = vld [vmem:[%s3021_s0 + $0xf8] sm:$0xff]  }
  0x11   :  { %2183 = vmatprep.subr.bf16.mxu1 %v2300_v18  ;;  %v2529_v48 = vld [vmem:[%s3023_s2] ss:$0 sm:$0xff] }
  0x13   :  { %2106 = vmatpush3.bf16.msra.mxu0 %v2261_v5 }
  0x14   :  { %2107 = vmatprep.subr.bf16.mxu0 %v2262_v6  ;;  %2184 = vmatpush3.bf16.msra.mxu1 %v2300_v18 }
  0x15   :  { %2185 = vmatprep.subr.bf16.mxu1 %v2301_v19 }
  0x17   :  { %2108 = vmatpush3.bf16.msra.mxu0 %v2262_v6 }
  0x18   :  { %2109 = vmatprep.subr.bf16.mxu0 %v2263_v7  ;;  %2186 = vmatpush3.bf16.msra.mxu1 %v2301_v19 }
  0x19   :  { %2187 = vmatprep.subr.bf16.mxu1 %v2302_v22 }
  0x1b   :  { %2110 = vmatpush3.bf16.msra.mxu0 %v2263_v7 }
  0x1c   :  { %2111 = vmatprep.subr.bf16.mxu0 %v2264_v8  ;;  %2188 = vmatpush3.bf16.msra.mxu1 %v2302_v22 }
  0x1d   :  { %2189 = vmatprep.subr.bf16.mxu1 %v2303_v38 }
  0x1f   :  { %2112 = vmatpush3.bf16.msra.mxu0 %v2264_v8 }
  0x20   :  { %2190 = vmatpush3.bf16.msra.mxu1 %v2303_v38 }
  0x21   :  { %2191 = vmatprep.subr.bf16.mxu1 %v2304_v40 }
  0x22   :  { %2114 = vmatmul.mubr.bf16.vlgmr.msra.gmra.mrb[0].mxu0 %v2266_v9 }
  0x23   :  { %2117 = vmatprep.mubr.bf16.mxu0 %v2267_v10 }
  0x24   :  { %2192 = vmatpush3.bf16.msra.mxu1 %v2304_v40 }
  0x2a   :  { %2118 = vmatmul.mubr.bf16.gmra.mrb[4].mxu0 %v2268_v11 }
  0x2b   :  { %2121 = vmatprep.mubr.bf16.mxu0 %v2269_v12 }
  0x32   :  { %2122 = vmatmul.mubr.bf16.gmra.mrb[8].mxu0 %v2270_v16 }
  0x33   :  { %2125 = vmatprep.mubr.bf16.mxu0 %v2271_v17 }
  0x3a   :  { %2126 = vmatmul.mubr.bf16.gmra.mrb[12].mxu0 %v2272_v20 }
  0x3b   :  { %2129 = vmatprep.mubr.bf16.mxu0 %v2273_v21 }
  0x42   :  { %2130 = vmatmul.mubr.bf16.gmra.mrb[16].mxu0 %v2274_v23 }
  0x43   :  { %2133 = vmatprep.mubr.bf16.mxu0 %v2275_v24 }
  0x4a   :  { %2134 = vmatmul.mubr.bf16.gmra.mrb[20].mxu0 %v2276_v25 }
  0x4b   :  { %2137 = vmatprep.mubr.bf16.mxu0 %v2277_v26 }
  0x52   :  { %2138 = vmatmul.mubr.bf16.gmra.mrb[24].mxu0 %v2278_v27 }
  0x53   :  { %2141 = vmatprep.mubr.bf16.mxu0 %v2279_v28 }
  0x5a   :  { %2142 = vmatmul.mubr.bf16.gmra.mrb[28].mxu0 %v2280_v29 }
  0x5b   :  { %2145 = vmatprep.mubr.bf16.mxu0 %v2281_v30 }
  0x62   :  { %2146 = vmatmul.mubr.bf16.gmra.mrb[32].mxu0 %v2282_v31 }
  0x63   :  { %2149 = vmatprep.mubr.bf16.mxu0 %v2283_v32 }
  0x6a   :  { %2150 = vmatmul.mubr.bf16.gmra.mrb[36].mxu0 %v2284_v33 }
  0x6b   :  { %2153 = vmatprep.mubr.bf16.mxu0 %v2285_v34 }
  0x72   :  { %2154 = vmatmul.mubr.bf16.gmra.mrb[40].mxu0 %v2286_v35 }
  0x73   :  { %2157 = vmatprep.mubr.bf16.mxu0 %v2287_v36 }
  0x7a   :  { %2158 = vmatmul.mubr.bf16.gmra.mrb[44].mxu0 %v2288_v37 }
  0x7b   :  { %2161 = vmatprep.mubr.bf16.mxu0 %v2289_v39 }
  0x82   :  { %2162 = vmatmul.mubr.bf16.gmra.mrb[48].mxu0 %v2290_v41 }
  0x83   :  { %2165 = vmatprep.mubr.bf16.mxu0 %v2291_v42 }
  0x8a   :  { %2166 = vmatmul.mubr.bf16.gmra.mrb[52].mxu0 %v2292_v43 }
  0x8b   :  { %2169 = vmatprep.mubr.bf16.mxu0 %v2293_v44 }
  0x92   :  { %2170 = vmatmul.mubr.bf16.gmra.mrb[56].mxu0 %v2294_v45 }
  0x93   :  { %2173 = vmatprep.mubr.bf16.mxu0 %v2295_v46 }
  0x9a   :  { %2174 = vmatmul.mubr.bf16.gmra.mrb[60].mxu0 %v2296_v47 }
  0xf5   :  { %v2115_v49 = vpop.f32.mrb[0].mxu0 }
  0xf6   :  { %v394_v50 = vadd.f32 %v2115_v49, %v2529_v48  ;;  %v385_v51 = vpop.f32.mrb[1].mxu0 }
  0xf7   :  { %v386_v52 = vadd.f32 %v2529_v48, %v385_v51  ;;  %v2116_v53 = vpop.f32.mrb[2].mxu0 }
  0xf8   :  { %v397_v54 = vadd.f32 %v2116_v53, %v2529_v48  ;;  %v388_v55 = vpop.f32.mrb[3].mxu0  ;;  %v642_v57 = vmax.f32 %v394_v50, 0.0 }
  0xf9   :  { %v389_v56 = vadd.f32 %v2529_v48, %v388_v55  ;;  %v640_v59 = vmax.f32 %v386_v52, 0.0 }
  0xfa   :  { %v643_v58 = vmax.f32 %v397_v54, 0.0 }
  0xfb   :  { %v641_v60 = vmax.f32 %v389_v56, 0.0 }
  0xfc   :  { %v705_v61 = vpack.c.bf16 %v643_v58, %v642_v57 }
  0xfd   :  { %v2119_v62 = vpop.f32.mrb[4].mxu0  ;;  %v704_v63 = vpack.c.bf16 %v641_v60, %v640_v59 }
  0xfe   :  { %v410_v0 = vadd.f32 %v2119_v62, %v2529_v48  ;;  %v401_v1 = vpop.f32.mrb[5].mxu0 }
  0xff   :  { %v402_v2 = vadd.f32 %v2529_v48, %v401_v1  ;;  %v2120_v3 = vpop.f32.mrb[6].mxu0  ;;  %2193 = vmatprep.mubr.bf16.mxu1 %v704_v63 }
 0x100   :  { %v413_v4 = vadd.f32 %v2120_v3, %v2529_v48  ;;  %v404_v5 = vpop.f32.mrb[7].mxu0  ;;  %2194 = vmatmul.mubr.bf16.vlgmr.msra.gmra.mrb[0].mxu1 %v705_v61  ;;  %v646_v7 = vmax.f32 %v410_v0, 0.0 }
 0x101   :  { %v405_v6 = vadd.f32 %v2529_v48, %v404_v5  ;;  %v644_v9 = vmax.f32 %v402_v2, 0.0 }
 0x102   :  { %v647_v8 = vmax.f32 %v413_v4, 0.0 }
 0x103   :  { %v645_v10 = vmax.f32 %v405_v6, 0.0 }
 0x104   :  { %v707_v11 = vpack.c.bf16 %v647_v8, %v646_v7 }
 0x105   :  { %v706_v12 = vpack.c.bf16 %v645_v10, %v644_v9  ;;  %v2123_v13 = vpop.f32.mrb[8].mxu0 }
 0x106   :  { %v426_v14 = vadd.f32 %v2123_v13, %v2529_v48  ;;  %v417_v15 = vpop.f32.mrb[9].mxu0 }
 0x107   :  { %v418_v16 = vadd.f32 %v2529_v48, %v417_v15  ;;  %v2124_v17 = vpop.f32.mrb[10].mxu0  ;;  %2197 = vmatprep.mubr.bf16.mxu1 %v706_v12 }
 0x108   :  { %v429_v18 = vadd.f32 %v2124_v17, %v2529_v48  ;;  %v420_v19 = vpop.f32.mrb[11].mxu0  ;;  %2198 = vmatmul.mubr.bf16.gmra.mrb[4].mxu1 %v707_v11  ;;  %v650_v21 = vmax.f32 %v426_v14, 0.0 }
 0x109   :  { %v421_v20 = vadd.f32 %v2529_v48, %v420_v19  ;;  %v648_v23 = vmax.f32 %v418_v16, 0.0 }
 0x10a   :  { %v651_v22 = vmax.f32 %v429_v18, 0.0 }
 0x10b   :  { %v649_v24 = vmax.f32 %v421_v20, 0.0 }
 0x10c   :  { %v709_v25 = vpack.c.bf16 %v651_v22, %v650_v21 }
 0x10d   :  { %v708_v26 = vpack.c.bf16 %v649_v24, %v648_v23  ;;  %v2127_v27 = vpop.f32.mrb[12].mxu0 }
 0x10e   :  { %v442_v28 = vadd.f32 %v2127_v27, %v2529_v48  ;;  %v433_v29 = vpop.f32.mrb[13].mxu0 }
 0x10f   :  { %v434_v30 = vadd.f32 %v2529_v48, %v433_v29  ;;  %v2128_v31 = vpop.f32.mrb[14].mxu0  ;;  %2201 = vmatprep.mubr.bf16.mxu1 %v708_v26 }
 0x110   :  { %v445_v32 = vadd.f32 %v2128_v31, %v2529_v48  ;;  %v436_v33 = vpop.f32.mrb[15].mxu0  ;;  %2202 = vmatmul.mubr.bf16.gmra.mrb[8].mxu1 %v709_v25  ;;  %v654_v35 = vmax.f32 %v442_v28, 0.0 }
 0x111   :  { %v437_v34 = vadd.f32 %v2529_v48, %v436_v33  ;;  %v652_v37 = vmax.f32 %v434_v30, 0.0 }
 0x112   :  { %v655_v36 = vmax.f32 %v445_v32, 0.0 }
 0x113   :  { %v653_v38 = vmax.f32 %v437_v34, 0.0 }
 0x114   :  { %v711_v39 = vpack.c.bf16 %v655_v36, %v654_v35 }
 0x115   :  { %v710_v40 = vpack.c.bf16 %v653_v38, %v652_v37  ;;  %v2131_v41 = vpop.f32.mrb[16].mxu0 }
 0x116   :  { %v458_v42 = vadd.f32 %v2131_v41, %v2529_v48  ;;  %v449_v43 = vpop.f32.mrb[17].mxu0 }
 0x117   :  { %v450_v44 = vadd.f32 %v2529_v48, %v449_v43  ;;  %v2132_v45 = vpop.f32.mrb[18].mxu0  ;;  %2205 = vmatprep.mubr.bf16.mxu1 %v710_v40 }
 0x118   :  { %v461_v46 = vadd.f32 %v2132_v45, %v2529_v48  ;;  %v452_v47 = vpop.f32.mrb[19].mxu0  ;;  %2206 = vmatmul.mubr.bf16.gmra.mrb[12].mxu1 %v711_v39  ;;  %v658_v50 = vmax.f32 %v458_v42, 0.0 }
 0x119   :  { %v453_v49 = vadd.f32 %v2529_v48, %v452_v47  ;;  %v656_v52 = vmax.f32 %v450_v44, 0.0 }
 0x11a   :  { %v659_v51 = vmax.f32 %v461_v46, 0.0 }
 0x11b   :  { %v657_v53 = vmax.f32 %v453_v49, 0.0 }
 0x11c   :  { %v713_v54 = vpack.c.bf16 %v659_v51, %v658_v50 }
 0x11d   :  { %v712_v55 = vpack.c.bf16 %v657_v53, %v656_v52  ;;  %v2135_v56 = vpop.f32.mrb[20].mxu0 }
 0x11e   :  { %v474_v57 = vadd.f32 %v2135_v56, %v2529_v48  ;;  %v465_v58 = vpop.f32.mrb[21].mxu0 }
 0x11f   :  { %v466_v59 = vadd.f32 %v2529_v48, %v465_v58  ;;  %v2136_v60 = vpop.f32.mrb[22].mxu0  ;;  %2209 = vmatprep.mubr.bf16.mxu1 %v712_v55 }
 0x120   :  { %v477_v61 = vadd.f32 %v2136_v60, %v2529_v48  ;;  %v468_v62 = vpop.f32.mrb[23].mxu0  ;;  %2210 = vmatmul.mubr.bf16.gmra.mrb[16].mxu1 %v713_v54  ;;  %v662_v0 = vmax.f32 %v474_v57, 0.0 }
 0x121   :  { %v469_v63 = vadd.f32 %v2529_v48, %v468_v62  ;;  %v660_v2 = vmax.f32 %v466_v59, 0.0 }
 0x122   :  { %v663_v1 = vmax.f32 %v477_v61, 0.0 }
 0x123   :  { %v661_v3 = vmax.f32 %v469_v63, 0.0 }
 0x124   :  { %v715_v4 = vpack.c.bf16 %v663_v1, %v662_v0 }
 0x125   :  { %v714_v5 = vpack.c.bf16 %v661_v3, %v660_v2  ;;  %v2139_v6 = vpop.f32.mrb[24].mxu0 }
 0x126   :  { %v490_v7 = vadd.f32 %v2139_v6, %v2529_v48  ;;  %v481_v8 = vpop.f32.mrb[25].mxu0 }
 0x127   :  { %v482_v9 = vadd.f32 %v2529_v48, %v481_v8  ;;  %v2140_v10 = vpop.f32.mrb[26].mxu0  ;;  %2213 = vmatprep.mubr.bf16.mxu1 %v714_v5 }
 0x128   :  { %v493_v11 = vadd.f32 %v2140_v10, %v2529_v48  ;;  %v484_v12 = vpop.f32.mrb[27].mxu0  ;;  %2214 = vmatmul.mubr.bf16.gmra.mrb[20].mxu1 %v715_v4  ;;  %v666_v14 = vmax.f32 %v490_v7, 0.0 }
 0x129   :  { %v485_v13 = vadd.f32 %v2529_v48, %v484_v12  ;;  %v664_v16 = vmax.f32 %v482_v9, 0.0 }
 0x12a   :  { %v667_v15 = vmax.f32 %v493_v11, 0.0 }
 0x12b   :  { %v665_v17 = vmax.f32 %v485_v13, 0.0 }
 0x12c   :  { %v717_v18 = vpack.c.bf16 %v667_v15, %v666_v14 }
 0x12d   :  { %v716_v19 = vpack.c.bf16 %v665_v17, %v664_v16  ;;  %v2143_v20 = vpop.f32.mrb[28].mxu0 }
 0x12e   :  { %v506_v21 = vadd.f32 %v2143_v20, %v2529_v48  ;;  %v497_v22 = vpop.f32.mrb[29].mxu0 }
 0x12f   :  { %v498_v23 = vadd.f32 %v2529_v48, %v497_v22  ;;  %v2144_v24 = vpop.f32.mrb[30].mxu0  ;;  %2217 = vmatprep.mubr.bf16.mxu1 %v716_v19 }
 0x130   :  { %v509_v25 = vadd.f32 %v2144_v24, %v2529_v48  ;;  %v500_v26 = vpop.f32.mrb[31].mxu0  ;;  %2218 = vmatmul.mubr.bf16.gmra.mrb[24].mxu1 %v717_v18  ;;  %v670_v28 = vmax.f32 %v506_v21, 0.0 }
 0x131   :  { %v501_v27 = vadd.f32 %v2529_v48, %v500_v26  ;;  %v668_v30 = vmax.f32 %v498_v23, 0.0 }
 0x132   :  { %v671_v29 = vmax.f32 %v509_v25, 0.0 }
 0x133   :  { %v669_v31 = vmax.f32 %v501_v27, 0.0 }
 0x134   :  { %v719_v32 = vpack.c.bf16 %v671_v29, %v670_v28 }
 0x135   :  { %v718_v33 = vpack.c.bf16 %v669_v31, %v668_v30  ;;  %v2147_v34 = vpop.f32.mrb[32].mxu0 }
 0x136   :  { %v522_v35 = vadd.f32 %v2147_v34, %v2529_v48  ;;  %v513_v36 = vpop.f32.mrb[33].mxu0 }
 0x137   :  { %v514_v37 = vadd.f32 %v2529_v48, %v513_v36  ;;  %v2148_v38 = vpop.f32.mrb[34].mxu0  ;;  %2221 = vmatprep.mubr.bf16.mxu1 %v718_v33 }
 0x138   :  { %v525_v39 = vadd.f32 %v2148_v38, %v2529_v48  ;;  %v516_v40 = vpop.f32.mrb[35].mxu0  ;;  %2222 = vmatmul.mubr.bf16.gmra.mrb[28].mxu1 %v719_v32  ;;  %v674_v42 = vmax.f32 %v522_v35, 0.0 }
 0x139   :  { %v517_v41 = vadd.f32 %v2529_v48, %v516_v40  ;;  %v672_v44 = vmax.f32 %v514_v37, 0.0 }
 0x13a   :  { %v675_v43 = vmax.f32 %v525_v39, 0.0 }
 0x13b   :  { %v673_v45 = vmax.f32 %v517_v41, 0.0 }
 0x13c   :  { %v721_v46 = vpack.c.bf16 %v675_v43, %v674_v42 }
 0x13d   :  { %v720_v47 = vpack.c.bf16 %v673_v45, %v672_v44  ;;  %v2151_v49 = vpop.f32.mrb[36].mxu0 }
 0x13e   :  { %v538_v50 = vadd.f32 %v2151_v49, %v2529_v48  ;;  %v529_v51 = vpop.f32.mrb[37].mxu0 }
 0x13f   :  { %v530_v52 = vadd.f32 %v2529_v48, %v529_v51  ;;  %v2152_v53 = vpop.f32.mrb[38].mxu0  ;;  %2225 = vmatprep.mubr.bf16.mxu1 %v720_v47 }
 0x140   :  { %v541_v54 = vadd.f32 %v2152_v53, %v2529_v48  ;;  %v532_v55 = vpop.f32.mrb[39].mxu0  ;;  %2226 = vmatmul.mubr.bf16.gmra.mrb[32].mxu1 %v721_v46  ;;  %v678_v57 = vmax.f32 %v538_v50, 0.0 }
 0x141   :  { %v533_v56 = vadd.f32 %v2529_v48, %v532_v55  ;;  %v676_v59 = vmax.f32 %v530_v52, 0.0 }
 0x142   :  { %v679_v58 = vmax.f32 %v541_v54, 0.0 }
 0x143   :  { %v677_v60 = vmax.f32 %v533_v56, 0.0 }
 0x144   :  { %v723_v61 = vpack.c.bf16 %v679_v58, %v678_v57 }
 0x145   :  { %v722_v62 = vpack.c.bf16 %v677_v60, %v676_v59  ;;  %v2155_v63 = vpop.f32.mrb[40].mxu0 }
 0x146   :  { %v554_v0 = vadd.f32 %v2155_v63, %v2529_v48  ;;  %v545_v1 = vpop.f32.mrb[41].mxu0 }
 0x147   :  { %v546_v2 = vadd.f32 %v2529_v48, %v545_v1  ;;  %v2156_v3 = vpop.f32.mrb[42].mxu0  ;;  %2229 = vmatprep.mubr.bf16.mxu1 %v722_v62 }
 0x148   :  { %v557_v4 = vadd.f32 %v2156_v3, %v2529_v48  ;;  %v548_v5 = vpop.f32.mrb[43].mxu0  ;;  %2230 = vmatmul.mubr.bf16.gmra.mrb[36].mxu1 %v723_v61  ;;  %v682_v7 = vmax.f32 %v554_v0, 0.0 }
 0x149   :  { %v549_v6 = vadd.f32 %v2529_v48, %v548_v5  ;;  %v680_v9 = vmax.f32 %v546_v2, 0.0 }
 0x14a   :  { %v683_v8 = vmax.f32 %v557_v4, 0.0 }
 0x14b   :  { %v681_v10 = vmax.f32 %v549_v6, 0.0 }
 0x14c   :  { %v725_v11 = vpack.c.bf16 %v683_v8, %v682_v7 }
 0x14d   :  { %v724_v12 = vpack.c.bf16 %v681_v10, %v680_v9  ;;  %v2159_v13 = vpop.f32.mrb[44].mxu0 }
 0x14e   :  { %v570_v14 = vadd.f32 %v2159_v13, %v2529_v48  ;;  %v561_v15 = vpop.f32.mrb[45].mxu0 }
 0x14f   :  { %v562_v16 = vadd.f32 %v2529_v48, %v561_v15  ;;  %v2160_v17 = vpop.f32.mrb[46].mxu0  ;;  %2233 = vmatprep.mubr.bf16.mxu1 %v724_v12 }
 0x150   :  { %v573_v18 = vadd.f32 %v2160_v17, %v2529_v48  ;;  %v564_v19 = vpop.f32.mrb[47].mxu0  ;;  %2234 = vmatmul.mubr.bf16.gmra.mrb[40].mxu1 %v725_v11  ;;  %v686_v21 = vmax.f32 %v570_v14, 0.0 }
 0x151   :  { %v565_v20 = vadd.f32 %v2529_v48, %v564_v19  ;;  %v684_v23 = vmax.f32 %v562_v16, 0.0 }
 0x152   :  { %v687_v22 = vmax.f32 %v573_v18, 0.0 }
 0x153   :  { %v685_v24 = vmax.f32 %v565_v20, 0.0  ;;  %v2598_v20 = vld [vmem:[%s3024_s4] ss:$0 sm:$0xff] }
 0x154   :  { %v727_v25 = vpack.c.bf16 %v687_v22, %v686_v21 }
 0x155   :  { %v726_v26 = vpack.c.bf16 %v685_v24, %v684_v23  ;;  %v2163_v27 = vpop.f32.mrb[48].mxu0 }
 0x156   :  { %v586_v28 = vadd.f32 %v2163_v27, %v2529_v48  ;;  %v577_v29 = vpop.f32.mrb[49].mxu0 }
 0x157   :  { %v578_v30 = vadd.f32 %v2529_v48, %v577_v29  ;;  %v2164_v31 = vpop.f32.mrb[50].mxu0  ;;  %2237 = vmatprep.mubr.bf16.mxu1 %v726_v26 }
 0x158   :  { %v589_v32 = vadd.f32 %v2164_v31, %v2529_v48  ;;  %v580_v33 = vpop.f32.mrb[51].mxu0  ;;  %2238 = vmatmul.mubr.bf16.gmra.mrb[44].mxu1 %v727_v25  ;;  %v690_v35 = vmax.f32 %v586_v28, 0.0  ;;  %v2307_v28 = vld [vmem:[%s3025_s5 + $0x4] ss:$8 sps:$4 sm:$0xff]  }
 0x159   :  { %v581_v34 = vadd.f32 %v2529_v48, %v580_v33  ;;  %v688_v37 = vmax.f32 %v578_v30, 0.0  ;;  %1392 = vmatprep.mubr.bf16.mxu0 %v2307_v28 }
 0x15a   :  { %v691_v36 = vmax.f32 %v589_v32, 0.0 }
 0x15b   :  { %v689_v38 = vmax.f32 %v581_v34, 0.0 }
 0x15c   :  { %v729_v39 = vpack.c.bf16 %v691_v36, %v690_v35 }
 0x15d   :  { %v728_v40 = vpack.c.bf16 %v689_v38, %v688_v37  ;;  %v2167_v41 = vpop.f32.mrb[52].mxu0 }
 0x15e   :  { %v602_v42 = vadd.f32 %v2167_v41, %v2529_v48  ;;  %v593_v43 = vpop.f32.mrb[53].mxu0 }
 0x15f   :  { %v594_v44 = vadd.f32 %v2529_v48, %v593_v43  ;;  %v2168_v45 = vpop.f32.mrb[54].mxu0  ;;  %2241 = vmatprep.mubr.bf16.mxu1 %v728_v40 }
 0x160   :  { %v605_v46 = vadd.f32 %v2168_v45, %v2529_v48  ;;  %v596_v47 = vpop.f32.mrb[55].mxu0  ;;  %2242 = vmatmul.mubr.bf16.gmra.mrb[48].mxu1 %v729_v39  ;;  %v694_v50 = vmax.f32 %v602_v42, 0.0 }
 0x161   :  { %v597_v49 = vadd.f32 %v2529_v48, %v596_v47  ;;  %v692_v52 = vmax.f32 %v594_v44, 0.0 }
 0x162   :  { %v695_v51 = vmax.f32 %v605_v46, 0.0 }
 0x163   :  { %v693_v53 = vmax.f32 %v597_v49, 0.0 }
 0x164   :  { %v731_v54 = vpack.c.bf16 %v695_v51, %v694_v50 }
 0x165   :  { %v730_v55 = vpack.c.bf16 %v693_v53, %v692_v52  ;;  %v2171_v56 = vpop.f32.mrb[56].mxu0 }
 0x166   :  { %v618_v57 = vadd.f32 %v2171_v56, %v2529_v48  ;;  %v609_v58 = vpop.f32.mrb[57].mxu0 }
 0x167   :  { %v610_v59 = vadd.f32 %v2529_v48, %v609_v58  ;;  %v2172_v60 = vpop.f32.mrb[58].mxu0  ;;  %2245 = vmatprep.mubr.bf16.mxu1 %v730_v55 }
 0x168   :  { %v621_v61 = vadd.f32 %v2172_v60, %v2529_v48  ;;  %v612_v62 = vpop.f32.mrb[59].mxu0  ;;  %2246 = vmatmul.mubr.bf16.gmra.mrb[52].mxu1 %v731_v54  ;;  %v698_v0 = vmax.f32 %v618_v57, 0.0 }
 0x169   :  { %v613_v63 = vadd.f32 %v2529_v48, %v612_v62  ;;  %v696_v2 = vmax.f32 %v610_v59, 0.0 }
 0x16a   :  { %v699_v1 = vmax.f32 %v621_v61, 0.0 }
 0x16b   :  { %v697_v3 = vmax.f32 %v613_v63, 0.0 }
 0x16c   :  { %v733_v4 = vpack.c.bf16 %v699_v1, %v698_v0 }
 0x16d   :  { %v732_v5 = vpack.c.bf16 %v697_v3, %v696_v2  ;;  %v2175_v6 = vpop.f32.mrb[60].mxu0 }
 0x16e   :  { %v634_v7 = vadd.f32 %v2175_v6, %v2529_v48  ;;  %v625_v8 = vpop.f32.mrb[61].mxu0 }
 0x16f   :  { %v626_v9 = vadd.f32 %v2529_v48, %v625_v8  ;;  %v2176_v10 = vpop.f32.mrb[62].mxu0  ;;  %2249 = vmatprep.mubr.bf16.mxu1 %v732_v5 }
 0x170   :  { %v637_v11 = vadd.f32 %v2176_v10, %v2529_v48  ;;  %v628_v12 = vpop.f32.mrb[63].mxu0  ;;  %2250 = vmatmul.mubr.bf16.gmra.mrb[56].mxu1 %v733_v4  ;;  %v702_v14 = vmax.f32 %v634_v7, 0.0 }
 0x171   :  { %v629_v13 = vadd.f32 %v2529_v48, %v628_v12  ;;  %v700_v16 = vmax.f32 %v626_v9, 0.0 }
 0x172   :  { %v703_v15 = vmax.f32 %v637_v11, 0.0 }
 0x173   :  { %v701_v17 = vmax.f32 %v629_v13, 0.0 }
 0x174   :  { %v735_v18 = vpack.c.bf16 %v703_v15, %v702_v14 }
 0x175   :  { %v734_v19 = vpack.c.bf16 %v701_v17, %v700_v16 }
 0x177   :  { %2253 = vmatprep.mubr.bf16.mxu1 %v734_v19 }
 0x178   :  { %2254 = vmatmul.mubr.bf16.gmra.mrb[60].mxu1 %v735_v18 }
 0x179   :  { %1565 = vmatprep.mubr.bf16.mxu1 %v2307_v28 }
 0x1d3   :  { %v2195_v21 = vpop.f32.mrb[0].mxu1 }
 0x1d4   :  { %v850_v22 = vadd.f32 %v2195_v21, %v2598_v20  ;;  %v841_v23 = vpop.f32.mrb[1].mxu1 }
 0x1d5   :  { %v842_v24 = vadd.f32 %v2598_v20, %v841_v23  ;;  %v2196_v48 = vpop.f32.mrb[2].mxu1 }
 0x1d6   :  { %v853_v25 = vadd.f32 %v2196_v48, %v2598_v20  ;;  %v844_v26 = vpop.f32.mrb[3].mxu1  ;;  %v1098_v29 = vmax.f32 %v850_v22, 0.0 }
 0x1d7   :  { %v845_v27 = vadd.f32 %v2598_v20, %v844_v26  ;;  %v1096_v31 = vmax.f32 %v842_v24, 0.0 }
 0x1d8   :  { %v1099_v30 = vmax.f32 %v853_v25, 0.0 }
 0x1d9   :  { %v1097_v32 = vmax.f32 %v845_v27, 0.0 }
 0x1da   :  { %v2607_v33 = vpack.c.bf16 %v1099_v30, %v1098_v29 }
 0x1db   :  { %v2609_v34 = vpack.c.bf16 %v1097_v32, %v1096_v31  ;;  %v2199_v35 = vpop.f32.mrb[4].mxu1 }
 0x1dc   :  { %v866_v36 = vadd.f32 %v2199_v35, %v2598_v20  ;;  %v857_v37 = vpop.f32.mrb[5].mxu1 }
 0x1dd   :  { %v858_v38 = vadd.f32 %v2598_v20, %v857_v37  ;;  %v2200_v39 = vpop.f32.mrb[6].mxu1 }
 0x1de   :  { %v869_v40 = vadd.f32 %v2200_v39, %v2598_v20  ;;  %v860_v41 = vpop.f32.mrb[7].mxu1  ;;  %v1102_v43 = vmax.f32 %v866_v36, 0.0 }
 0x1df   :  { %v861_v42 = vadd.f32 %v2598_v20, %v860_v41  ;;  %v1100_v45 = vmax.f32 %v858_v38, 0.0 }
 0x1e0   :  { %v1103_v44 = vmax.f32 %v869_v40, 0.0 }
 0x1e1   :  { %v1101_v46 = vmax.f32 %v861_v42, 0.0 }
 0x1e2   :  { %v2615_v47 = vpack.c.bf16 %v1103_v44, %v1102_v43 }
 0x1e3   :  { %v2617_v49 = vpack.c.bf16 %v1101_v46, %v1100_v45  ;;  %v2203_v50 = vpop.f32.mrb[8].mxu1 }
 0x1e4   :  { %v882_v51 = vadd.f32 %v2203_v50, %v2598_v20  ;;  %v873_v52 = vpop.f32.mrb[9].mxu1 }
 0x1e5   :  { %v874_v53 = vadd.f32 %v2598_v20, %v873_v52  ;;  %v2204_v54 = vpop.f32.mrb[10].mxu1 }
 0x1e6   :  { %v885_v55 = vadd.f32 %v2204_v54, %v2598_v20  ;;  %v876_v56 = vpop.f32.mrb[11].mxu1  ;;  %v1106_v58 = vmax.f32 %v882_v51, 0.0 }
 0x1e7   :  { %v877_v57 = vadd.f32 %v2598_v20, %v876_v56  ;;  %v1104_v60 = vmax.f32 %v874_v53, 0.0 }
 0x1e8   :  { %v1107_v59 = vmax.f32 %v885_v55, 0.0 }
 0x1e9   :  { %v1105_v61 = vmax.f32 %v877_v57, 0.0 }
 0x1ea   :  { %v2623_v62 = vpack.c.bf16 %v1107_v59, %v1106_v58 }
 0x1eb   :  { %v2625_v63 = vpack.c.bf16 %v1105_v61, %v1104_v60  ;;  %v2207_v0 = vpop.f32.mrb[12].mxu1 }
 0x1ec   :  { %v898_v1 = vadd.f32 %v2207_v0, %v2598_v20  ;;  %v889_v2 = vpop.f32.mrb[13].mxu1 }
 0x1ed   :  { %v890_v3 = vadd.f32 %v2598_v20, %v889_v2  ;;  %v2208_v4 = vpop.f32.mrb[14].mxu1 }
 0x1ee   :  { %v901_v5 = vadd.f32 %v2208_v4, %v2598_v20  ;;  %v892_v6 = vpop.f32.mrb[15].mxu1  ;;  %v1110_v8 = vmax.f32 %v898_v1, 0.0 }
 0x1ef   :  { %v893_v7 = vadd.f32 %v2598_v20, %v892_v6  ;;  %v1108_v10 = vmax.f32 %v890_v3, 0.0 }
 0x1f0   :  { %v1111_v9 = vmax.f32 %v901_v5, 0.0 }
 0x1f1   :  { %v1109_v11 = vmax.f32 %v893_v7, 0.0 }
 0x1f2   :  { %v2631_v12 = vpack.c.bf16 %v1111_v9, %v1110_v8 }
 0x1f3   :  { %v2633_v13 = vpack.c.bf16 %v1109_v11, %v1108_v10  ;;  %v2211_v14 = vpop.f32.mrb[16].mxu1 }
 0x1f4   :  { %v914_v15 = vadd.f32 %v2211_v14, %v2598_v20  ;;  %v905_v16 = vpop.f32.mrb[17].mxu1 }
 0x1f5   :  { %v906_v17 = vadd.f32 %v2598_v20, %v905_v16  ;;  %v2212_v18 = vpop.f32.mrb[18].mxu1 }
 0x1f6   :  { %v917_v19 = vadd.f32 %v2212_v18, %v2598_v20  ;;  %v908_v21 = vpop.f32.mrb[19].mxu1  ;;  %v1114_v23 = vmax.f32 %v914_v15, 0.0 }
 0x1f7   :  { %v909_v22 = vadd.f32 %v2598_v20, %v908_v21  ;;  %v1112_v48 = vmax.f32 %v906_v17, 0.0 }
 0x1f8   :  { %v1115_v24 = vmax.f32 %v917_v19, 0.0 }
 0x1f9   :  { %v1113_v25 = vmax.f32 %v909_v22, 0.0  ;;  %v2665_v22 = vld [vmem:[%s3025_s5] ss:$8 sps:$4 sm:$0xff]  }
 0x1fa   :  { %v1169_v26 = vpack.c.bf16 %v1115_v24, %v1114_v23 }
 0x1fb   :  { %v1168_v27 = vpack.c.bf16 %v1113_v25, %v1112_v48  ;;  %v2215_v28 = vpop.f32.mrb[20].mxu1 }
 0x1fc   :  { %v930_v29 = vadd.f32 %v2215_v28, %v2598_v20  ;;  %v921_v30 = vpop.f32.mrb[21].mxu1 }
 0x1fd   :  { %v922_v31 = vadd.f32 %v2598_v20, %v921_v30  ;;  %v2216_v32 = vpop.f32.mrb[22].mxu1  ;;  %1897 = vmatprep.subr.bf16.mxu0 %v1168_v27 }
 0x1fe   :  { %v933_v35 = vadd.f32 %v2216_v32, %v2598_v20  ;;  %v924_v36 = vpop.f32.mrb[23].mxu1  ;;  %1898 = vmatpush3.bf16.msra.mxu0 %v2609_v34  ;;  %v1118_v38 = vmax.f32 %v930_v29, 0.0 }
 0x1ff   :  { %v925_v37 = vadd.f32 %v2598_v20, %v924_v36  ;;  %1899 = vmatprep.subr.bf16.mxu0 %v1169_v26  ;;  %v1116_v40 = vmax.f32 %v922_v31, 0.0 }
 0x200   :  { %v1119_v39 = vmax.f32 %v933_v35, 0.0 }
 0x201   :  { %v1117_v41 = vmax.f32 %v925_v37, 0.0  ;;  %v2686_v37 = vld [vmem:[%s3025_s5 + $0x10] ss:$8 sps:$4 sm:$0xff]  }
 0x202   :  { %v1171_v42 = vpack.c.bf16 %v1119_v39, %v1118_v38  ;;  %1900 = vmatpush3.bf16.msra.mxu0 %v2607_v33  ;;  %v2693_v39 = vld [vmem:[%s3025_s5 + $0x24] ss:$8 sps:$4 sm:$0xff]  }
 0x203   :  { %v1170_v43 = vpack.c.bf16 %v1117_v41, %v1116_v40  ;;  %v2219_v44 = vpop.f32.mrb[24].mxu1 }
 0x204   :  { %v946_v45 = vadd.f32 %v2219_v44, %v2598_v20  ;;  %v937_v46 = vpop.f32.mrb[25].mxu1 }
 0x205   :  { %v938_v50 = vadd.f32 %v2598_v20, %v937_v46  ;;  %v2220_v51 = vpop.f32.mrb[26].mxu1  ;;  %1901 = vmatprep.subr.bf16.mxu0 %v1170_v43 }
 0x206   :  { %v949_v34 = vadd.f32 %v2220_v51, %v2598_v20  ;;  %v940_v52 = vpop.f32.mrb[27].mxu1  ;;  %1902 = vmatpush3.bf16.msra.mxu0 %v2617_v49  ;;  %v1122_v54 = vmax.f32 %v946_v45, 0.0 }
 0x207   :  { %v941_v53 = vadd.f32 %v2598_v20, %v940_v52  ;;  %1903 = vmatprep.subr.bf16.mxu0 %v1171_v42  ;;  %v1120_v33 = vmax.f32 %v938_v50, 0.0 }
 0x208   :  { %v1123_v55 = vmax.f32 %v949_v34, 0.0 }
 0x209   :  { %v1121_v56 = vmax.f32 %v941_v53, 0.0 }
 0x20a   :  { %v1173_v57 = vpack.c.bf16 %v1123_v55, %v1122_v54  ;;  %1904 = vmatpush3.bf16.msra.mxu0 %v2615_v47  ;;  %v2706_v55 = vld [vmem:[%s3025_s5 + $0x20] ss:$8 sps:$4 sm:$0xff]  }
 0x20b   :  { %v1172_v58 = vpack.c.bf16 %v1121_v56, %v1120_v33  ;;  %v2223_v59 = vpop.f32.mrb[28].mxu1  ;;  %v2713_v56 = vld [vmem:[%s3025_s5 + $0x34] ss:$8 sps:$4 sm:$0xff]  }
 0x20c   :  { %v962_v60 = vadd.f32 %v2223_v59, %v2598_v20  ;;  %v953_v61 = vpop.f32.mrb[29].mxu1 }
 0x20d   :  { %v954_v0 = vadd.f32 %v2598_v20, %v953_v61  ;;  %v2224_v1 = vpop.f32.mrb[30].mxu1  ;;  %1905 = vmatprep.subr.bf16.mxu0 %v1172_v58 }
 0x20e   :  { %v965_v49 = vadd.f32 %v2224_v1, %v2598_v20  ;;  %v956_v2 = vpop.f32.mrb[31].mxu1  ;;  %1906 = vmatpush3.bf16.msra.mxu0 %v2625_v63  ;;  %v1126_v4 = vmax.f32 %v962_v60, 0.0 }
 0x20f   :  { %v957_v3 = vadd.f32 %v2598_v20, %v956_v2  ;;  %1907 = vmatprep.subr.bf16.mxu0 %v1173_v57  ;;  %v1124_v47 = vmax.f32 %v954_v0, 0.0 }
 0x210   :  { %v1127_v5 = vmax.f32 %v965_v49, 0.0 }
 0x211   :  { %v1125_v6 = vmax.f32 %v957_v3, 0.0 }
 0x212   :  { %v1175_v7 = vpack.c.bf16 %v1127_v5, %v1126_v4  ;;  %1908 = vmatpush3.bf16.msra.mxu0 %v2623_v62 }
 0x213   :  { %v1174_v8 = vpack.c.bf16 %v1125_v6, %v1124_v47  ;;  %v2227_v9 = vpop.f32.mrb[32].mxu1  ;;  %v2726_v6 = vld [vmem:[%s3025_s5 + $0x30] ss:$8 sps:$4 sm:$0xff]  }
 0x214   :  { %v978_v10 = vadd.f32 %v2227_v9, %v2598_v20  ;;  %v969_v11 = vpop.f32.mrb[33].mxu1 }
 0x215   :  { %v970_v14 = vadd.f32 %v2598_v20, %v969_v11  ;;  %v2228_v15 = vpop.f32.mrb[34].mxu1  ;;  %1909 = vmatprep.subr.bf16.mxu0 %v1174_v8  ;;  %v2733_v8 = vld [vmem:[%s3025_s5 + $0x44] ss:$8 sps:$4 sm:$0xff]  }
 0x216   :  { %v981_v63 = vadd.f32 %v2228_v15, %v2598_v20  ;;  %v972_v16 = vpop.f32.mrb[35].mxu1  ;;  %1910 = vmatpush3.bf16.msra.mxu0 %v2633_v13  ;;  %v1130_v18 = vmax.f32 %v978_v10, 0.0  ;;  %v2673_v13 = vld [vmem:[%s3025_s5 + $0x14] ss:$8 sps:$4 sm:$0xff]  }
 0x217   :  { %v973_v17 = vadd.f32 %v2598_v20, %v972_v16  ;;  %1911 = vmatprep.subr.bf16.mxu0 %v1175_v7  ;;  %v1128_v62 = vmax.f32 %v970_v14, 0.0 }
 0x218   :  { %v1131_v19 = vmax.f32 %v981_v63, 0.0 }
 0x219   :  { %v1129_v21 = vmax.f32 %v973_v17, 0.0 }
 0x21a   :  { %v2667_v23 = vpack.c.bf16 %v1131_v19, %v1130_v18  ;;  %1912 = vmatpush3.bf16.msra.mxu0 %v2631_v12 }
 0x21b   :  { %v2675_v24 = vpack.c.bf16 %v1129_v21, %v1128_v62  ;;  %v2231_v48 = vpop.f32.mrb[36].mxu1 }
 0x21c   :  { %v994_v25 = vadd.f32 %v2231_v48, %v2598_v20  ;;  %v985_v26 = vpop.f32.mrb[37].mxu1 }
 0x21d   :  { %v986_v27 = vadd.f32 %v2598_v20, %v985_v26  ;;  %v2232_v28 = vpop.f32.mrb[38].mxu1  ;;  %1393 = vmatmul.mubr.bf16.vlgmr.msra.gmra.mrb[64].mxu0 %v2665_v22 }
 0x21e   :  { %v997_v29 = vadd.f32 %v2232_v28, %v2598_v20  ;;  %v988_v30 = vpop.f32.mrb[39].mxu1  ;;  %1400 = vmatprep.mubr.bf16.mxu0 %v2673_v13  ;;  %v1134_v31 = vmax.f32 %v994_v25, 0.0  ;;  %v2746_v25 = vld [vmem:[%s3025_s5 + $0x40] ss:$8 sps:$4 sm:$0xff]  }
 0x21f   :  { %v989_v12 = vadd.f32 %v2598_v20, %v988_v30  ;;  %v1132_v35 = vmax.f32 %v986_v27, 0.0  ;;  %v2751_v27 = vld [vmem:[%s3025_s5 + $0x54] ss:$8 sps:$4 sm:$0xff]  }
 0x220   :  { %v1135_v32 = vmax.f32 %v997_v29, 0.0 }
 0x221   :  { %v1133_v36 = vmax.f32 %v989_v12, 0.0 }
 0x222   :  { %v2688_v38 = vpack.c.bf16 %v1135_v32, %v1134_v31 }
 0x223   :  { %v2695_v40 = vpack.c.bf16 %v1133_v36, %v1132_v35  ;;  %v2235_v41 = vpop.f32.mrb[40].mxu1 }
 0x224   :  { %v1010_v42 = vadd.f32 %v2235_v41, %v2598_v20  ;;  %v1001_v43 = vpop.f32.mrb[41].mxu1 }
 0x225   :  { %v1002_v44 = vadd.f32 %v2598_v20, %v1001_v43  ;;  %v2236_v45 = vpop.f32.mrb[42].mxu1  ;;  %1401 = vmatmul.mubr.bf16.gmra.mrb[68].mxu0 %v2686_v37 }
 0x226   :  { %v1013_v46 = vadd.f32 %v2236_v45, %v2598_v20  ;;  %v1004_v50 = vpop.f32.mrb[43].mxu1  ;;  %1408 = vmatprep.mubr.bf16.mxu0 %v2693_v39  ;;  %v1138_v34 = vmax.f32 %v1010_v42, 0.0 }
 0x227   :  { %v1005_v51 = vadd.f32 %v2598_v20, %v1004_v50  ;;  %v1136_v53 = vmax.f32 %v1002_v44, 0.0 }
 0x228   :  { %v1139_v52 = vmax.f32 %v1013_v46, 0.0  ;;  %v2763_v46 = vld [vmem:[%s3025_s5 + $0x50] ss:$8 sps:$4 sm:$0xff]  }
 0x229   :  { %v1137_v54 = vmax.f32 %v1005_v51, 0.0 }
 0x22a   :  { %v2708_v33 = vpack.c.bf16 %v1139_v52, %v1138_v34 }
 0x22b   :  { %v2715_v57 = vpack.c.bf16 %v1137_v54, %v1136_v53  ;;  %v2239_v58 = vpop.f32.mrb[44].mxu1 }
 0x22c   :  { %v1026_v59 = vadd.f32 %v2239_v58, %v2598_v20  ;;  %v1017_v60 = vpop.f32.mrb[45].mxu1 }
 0x22d   :  { %v1018_v61 = vadd.f32 %v2598_v20, %v1017_v60  ;;  %v2240_v0 = vpop.f32.mrb[46].mxu1  ;;  %1409 = vmatmul.mubr.bf16.gmra.mrb[72].mxu0 %v2706_v55 }
 0x22e   :  { %v1029_v1 = vadd.f32 %v2240_v0, %v2598_v20  ;;  %v1020_v49 = vpop.f32.mrb[47].mxu1  ;;  %1416 = vmatprep.mubr.bf16.mxu0 %v2713_v56  ;;  %v1142_v3 = vmax.f32 %v1026_v59, 0.0 }
 0x22f   :  { %v1021_v2 = vadd.f32 %v2598_v20, %v1020_v49  ;;  %v1140_v5 = vmax.f32 %v1018_v61, 0.0 }
 0x230   :  { %v1143_v4 = vmax.f32 %v1029_v1, 0.0 }
 0x231   :  { %v1141_v47 = vmax.f32 %v1021_v2, 0.0  ;;  %v2781_v2 = vld [vmem:[%s3025_s5 + $0x60] ss:$8 sps:$4 sm:$0xff]  }
 0x232   :  { %v2728_v7 = vpack.c.bf16 %v1143_v4, %v1142_v3 }
 0x233   :  { %v2735_v9 = vpack.c.bf16 %v1141_v47, %v1140_v5  ;;  %v2243_v10 = vpop.f32.mrb[48].mxu1 }
 0x234   :  { %v1042_v11 = vadd.f32 %v2243_v10, %v2598_v20  ;;  %v1033_v14 = vpop.f32.mrb[49].mxu1 }
 0x235   :  { %v1034_v15 = vadd.f32 %v2598_v20, %v1033_v14  ;;  %v2244_v63 = vpop.f32.mrb[50].mxu1  ;;  %1417 = vmatmul.mubr.bf16.gmra.mrb[76].mxu0 %v2726_v6 }
 0x236   :  { %v1045_v16 = vadd.f32 %v2244_v63, %v2598_v20  ;;  %v1036_v17 = vpop.f32.mrb[51].mxu1  ;;  %1424 = vmatprep.mubr.bf16.mxu0 %v2733_v8  ;;  %v1146_v19 = vmax.f32 %v1042_v11, 0.0 }
 0x237   :  { %v1037_v18 = vadd.f32 %v2598_v20, %v1036_v17  ;;  %v1144_v21 = vmax.f32 %v1034_v15, 0.0 }
 0x238   :  { %v1147_v62 = vmax.f32 %v1045_v16, 0.0 }
 0x239   :  { %v1145_v48 = vmax.f32 %v1037_v18, 0.0 }
 0x23a   :  { %v1185_v26 = vpack.c.bf16 %v1147_v62, %v1146_v19  ;;  %v2328_v62 = vld [vmem:[%s3025_s5 + $0x70] ss:$8 sps:$4 sm:$0xff]  }
 0x23b   :  { %v1184_v28 = vpack.c.bf16 %v1145_v48, %v1144_v21  ;;  %v2247_v29 = vpop.f32.mrb[52].mxu1 }
 0x23c   :  { %v1058_v30 = vadd.f32 %v2247_v29, %v2598_v20  ;;  %v1049_v12 = vpop.f32.mrb[53].mxu1 }
 0x23d   :  { %v1050_v31 = vadd.f32 %v2598_v20, %v1049_v12  ;;  %v2248_v32 = vpop.f32.mrb[54].mxu1  ;;  %1997 = vmatprep.subr.bf16.mxu1 %v1184_v28  ;;  %1425 = vmatmul.mubr.bf16.gmra.mrb[80].mxu0 %v2746_v25 }
 0x23e   :  { %v1061_v35 = vadd.f32 %v2248_v32, %v2598_v20  ;;  %v1052_v36 = vpop.f32.mrb[55].mxu1  ;;  %1998 = vmatpush3.bf16.msra.mxu1 %v2675_v24  ;;  %1432 = vmatprep.mubr.bf16.mxu0 %v2751_v27  ;;  %v1150_v42 = vmax.f32 %v1058_v30, 0.0  ;;  %v2769_v24 = vld [vmem:[%s3025_s5 + $0x64] ss:$8 sps:$4 sm:$0xff]  }
 0x23f   :  { %v1053_v41 = vadd.f32 %v2598_v20, %v1052_v36  ;;  %1999 = vmatprep.subr.bf16.mxu1 %v1185_v26  ;;  %v1148_v44 = vmax.f32 %v1050_v31, 0.0  ;;  %v2335_v26 = vld [vmem:[%s3025_s5 + $0xa4] ss:$8 sps:$4 sm:$0xff]  }
 0x240   :  { %v1151_v43 = vmax.f32 %v1061_v35, 0.0 }
 0x241   :  { %v1149_v45 = vmax.f32 %v1053_v41, 0.0 }
 0x242   :  { %v1187_v50 = vpack.c.bf16 %v1151_v43, %v1150_v42  ;;  %2000 = vmatpush3.bf16.msra.mxu1 %v2667_v23 }
 0x243   :  { %v1186_v51 = vpack.c.bf16 %v1149_v45, %v1148_v44  ;;  %v2251_v34 = vpop.f32.mrb[56].mxu1 }
 0x244   :  { %v1074_v52 = vadd.f32 %v2251_v34, %v2598_v20  ;;  %v1065_v53 = vpop.f32.mrb[57].mxu1 }
 0x245   :  { %v1066_v54 = vadd.f32 %v2598_v20, %v1065_v53  ;;  %v2252_v58 = vpop.f32.mrb[58].mxu1  ;;  %2001 = vmatprep.subr.bf16.mxu1 %v1186_v51  ;;  %1433 = vmatmul.mubr.bf16.gmra.mrb[84].mxu0 %v2763_v46 }
 0x246   :  { %v1077_v59 = vadd.f32 %v2252_v58, %v2598_v20  ;;  %v1068_v60 = vpop.f32.mrb[59].mxu1  ;;  %2002 = vmatpush3.bf16.msra.mxu1 %v2695_v40  ;;  %1440 = vmatprep.mubr.bf16.mxu0 %v2769_v24  ;;  %v1154_v61 = vmax.f32 %v1074_v52, 0.0  ;;  %v2787_v40 = vld [vmem:[%s3025_s5 + $0x74] ss:$8 sps:$4 sm:$0xff]  }
 0x247   :  { %v1069_v23 = vadd.f32 %v2598_v20, %v1068_v60  ;;  %2003 = vmatprep.subr.bf16.mxu1 %v1187_v50  ;;  %v1152_v1 = vmax.f32 %v1066_v54, 0.0 }
 0x248   :  { %v1155_v0 = vmax.f32 %v1077_v59, 0.0 }
 0x249   :  { %v1153_v49 = vmax.f32 %v1069_v23, 0.0 }
 0x24a   :  { %v1189_v3 = vpack.c.bf16 %v1155_v0, %v1154_v61  ;;  %2004 = vmatpush3.bf16.msra.mxu1 %v2688_v38 }
 0x24b   :  { %v1188_v4 = vpack.c.bf16 %v1153_v49, %v1152_v1  ;;  %v2255_v5 = vpop.f32.mrb[60].mxu1 }
 0x24c   :  { %v1090_v47 = vadd.f32 %v2255_v5, %v2598_v20  ;;  %v1081_v10 = vpop.f32.mrb[61].mxu1 }
 0x24d   :  { %v1082_v11 = vadd.f32 %v2598_v20, %v1081_v10  ;;  %v2256_v14 = vpop.f32.mrb[62].mxu1  ;;  %2005 = vmatprep.subr.bf16.mxu1 %v1188_v4  ;;  %1441 = vmatmul.mubr.bf16.gmra.mrb[88].mxu0 %v2781_v2 }
 0x24e   :  { %v1093_v15 = vadd.f32 %v2256_v14, %v2598_v20  ;;  %v1084_v63 = vpop.f32.mrb[63].mxu1  ;;  %2006 = vmatpush3.bf16.msra.mxu1 %v2715_v57  ;;  %1448 = vmatprep.mubr.bf16.mxu0 %v2787_v40  ;;  %v1158_v16 = vmax.f32 %v1090_v47, 0.0  ;;  %v2329_v57 = vld [vmem:[%s3025_s5 + $0x84] ss:$8 sps:$4 sm:$0xff]  }
 0x24f   :  { %v1085_v38 = vadd.f32 %v2598_v20, %v1084_v63  ;;  %2007 = vmatprep.subr.bf16.mxu1 %v1189_v3  ;;  %v1156_v18 = vmax.f32 %v1082_v11, 0.0  ;;  %v2331_v20 = vld [vmem:[%s3025_s5 + $0x80] ss:$8 sps:$4 sm:$0xff]  }
 0x250   :  { %v1159_v17 = vmax.f32 %v1093_v15, 0.0 }
 0x251   :  { %v1157_v19 = vmax.f32 %v1085_v38, 0.0 }
 0x252   :  { %v1191_v21 = vpack.c.bf16 %v1159_v17, %v1158_v16  ;;  %2008 = vmatpush3.bf16.msra.mxu1 %v2708_v33  ;;  %v2332_v33 = vld [vmem:[%s3025_s5 + $0x94] ss:$8 sps:$4 sm:$0xff]  }
 0x253   :  { %v1190_v48 = vpack.c.bf16 %v1157_v19, %v1156_v18 }
 0x255   :  { %2009 = vmatprep.subr.bf16.mxu1 %v1190_v48  ;;  %1449 = vmatmul.mubr.bf16.gmra.mrb[92].mxu0 %v2328_v62 }
 0x256   :  { %2010 = vmatpush3.bf16.msra.mxu1 %v2735_v9  ;;  %1456 = vmatprep.mubr.bf16.mxu0 %v2329_v57  ;;  %v2334_v9 = vld [vmem:[%s3025_s5 + $0x90] ss:$8 sps:$4 sm:$0xff]  }
 0x257   :  { %2011 = vmatprep.subr.bf16.mxu1 %v1191_v21 }
 0x25a   :  { %2012 = vmatpush3.bf16.msra.mxu1 %v2728_v7 }
 0x25d   :  { %1566 = vmatmul.mubr.bf16.vlgmr.msra.gmra.mrb[64].mxu1 %v2665_v22  ;;  %1457 = vmatmul.mubr.bf16.gmra.mrb[96].mxu0 %v2331_v20  ;;  %v2337_v22 = vld [vmem:[%s3025_s5 + $0xa0] ss:$8 sps:$4 sm:$0xff]  }
 0x25e   :  { %1573 = vmatprep.mubr.bf16.mxu1 %v2673_v13  ;;  %1464 = vmatprep.mubr.bf16.mxu0 %v2332_v33  ;;  %v2338_v13 = vld [vmem:[%s3025_s5 + $0xb4] ss:$8 sps:$4 sm:$0xff]  }
 0x265   :  { %1574 = vmatmul.mubr.bf16.gmra.mrb[68].mxu1 %v2686_v37  ;;  %1465 = vmatmul.mubr.bf16.gmra.mrb[100].mxu0 %v2334_v9  ;;  %v2340_v37 = vld [vmem:[%s3025_s5 + $0xb0] ss:$8 sps:$4 sm:$0xff]  }
 0x266   :  { %1581 = vmatprep.mubr.bf16.mxu1 %v2693_v39  ;;  %1472 = vmatprep.mubr.bf16.mxu0 %v2335_v26  ;;  %v2341_v39 = vld [vmem:[%s3025_s5 + $0xc4] ss:$8 sps:$4 sm:$0xff]  }
 0x26d   :  { %1582 = vmatmul.mubr.bf16.gmra.mrb[72].mxu1 %v2706_v55  ;;  %1473 = vmatmul.mubr.bf16.gmra.mrb[104].mxu0 %v2337_v22  ;;  %v2343_v55 = vld [vmem:[%s3025_s5 + $0xc0] ss:$8 sps:$4 sm:$0xff]  }
 0x26e   :  { %1589 = vmatprep.mubr.bf16.mxu1 %v2713_v56  ;;  %1480 = vmatprep.mubr.bf16.mxu0 %v2338_v13  ;;  %v2344_v56 = vld [vmem:[%s3025_s5 + $0xd4] ss:$8 sps:$4 sm:$0xff]  }
 0x275   :  { %1590 = vmatmul.mubr.bf16.gmra.mrb[76].mxu1 %v2726_v6  ;;  %1481 = vmatmul.mubr.bf16.gmra.mrb[108].mxu0 %v2340_v37  ;;  %v2346_v6 = vld [vmem:[%s3025_s5 + $0xd0] ss:$8 sps:$4 sm:$0xff]  }
 0x276   :  { %1597 = vmatprep.mubr.bf16.mxu1 %v2733_v8  ;;  %1488 = vmatprep.mubr.bf16.mxu0 %v2341_v39 }
 0x27d   :  { %1598 = vmatmul.mubr.bf16.gmra.mrb[80].mxu1 %v2746_v25  ;;  %1489 = vmatmul.mubr.bf16.gmra.mrb[112].mxu0 %v2343_v55 }
 0x27e   :  { %1605 = vmatprep.mubr.bf16.mxu1 %v2751_v27  ;;  %1496 = vmatprep.mubr.bf16.mxu0 %v2344_v56 }
 0x285   :  { %1606 = vmatmul.mubr.bf16.gmra.mrb[84].mxu1 %v2763_v46  ;;  %1497 = vmatmul.mubr.bf16.gmra.mrb[116].mxu0 %v2346_v6 }
 0x286   :  { %1613 = vmatprep.mubr.bf16.mxu1 %v2769_v24 }
 0x28d   :  { %1614 = vmatmul.mubr.bf16.gmra.mrb[88].mxu1 %v2781_v2 }
 0x28e   :  { %1621 = vmatprep.mubr.bf16.mxu1 %v2787_v40 }
 0x295   :  { %1622 = vmatmul.mubr.bf16.gmra.mrb[92].mxu1 %v2328_v62 }
 0x296   :  { %1629 = vmatprep.mubr.bf16.mxu1 %v2329_v57 }
 0x29d   :  { %1630 = vmatmul.mubr.bf16.gmra.mrb[96].mxu1 %v2331_v20 }
 0x29e   :  { %1637 = vmatprep.mubr.bf16.mxu1 %v2332_v33 }
 0x2a5   :  { %1638 = vmatmul.mubr.bf16.gmra.mrb[100].mxu1 %v2334_v9 }
 0x2a6   :  { %1645 = vmatprep.mubr.bf16.mxu1 %v2335_v26 }
 0x2ad   :  { %1646 = vmatmul.mubr.bf16.gmra.mrb[104].mxu1 %v2337_v22 }
 0x2ae   :  { %1653 = vmatprep.mubr.bf16.mxu1 %v2338_v13 }
 0x2b5   :  { %1654 = vmatmul.mubr.bf16.gmra.mrb[108].mxu1 %v2340_v37 }
 0x2b6   :  { %1661 = vmatprep.mubr.bf16.mxu1 %v2341_v39 }
 0x2bd   :  { %1662 = vmatmul.mubr.bf16.gmra.mrb[112].mxu1 %v2343_v55 }
 0x2be   :  { %1669 = vmatprep.mubr.bf16.mxu1 %v2344_v56 }
 0x2c5   :  { %1670 = vmatmul.mubr.bf16.gmra.mrb[116].mxu1 %v2346_v6 }
 0x2f0   :  { %v1913_v7 = vpop.f32.mrb[64].mxu0 }
 0x2f1   :  { %v1914_v8 = vpop.f32.mrb[65].mxu0 }
 0x2f2   :  { %v1915_v25 = vadd.f32 %v1914_v8, %v1913_v7  ;;  %v1916_v27 = vpop.f32.mrb[66].mxu0 }
 0x2f3   :  { %v1917_v28 = vpop.f32.mrb[67].mxu0 }
 0x2f4   :  { %1505 = vst [vmem:[%s3026_s6] sm:$0xff] %v1915_v25  ;;  %v1918_v29 = vadd.f32 %v1917_v28, %v1916_v27 }
 0x2f6   :  { %1506 = vst [vmem:[%s3026_s6 + $0x8] sm:$0xff] %v1918_v29 }
 0x2f8   :  { %v1919_v30 = vpop.f32.mrb[68].mxu0 }
 0x2f9   :  { %v1920_v12 = vpop.f32.mrb[69].mxu0 }
 0x2fa   :  { %v1921_v31 = vadd.f32 %v1920_v12, %v1919_v30  ;;  %v1922_v32 = vpop.f32.mrb[70].mxu0 }
 0x2fb   :  { %v1923_v35 = vpop.f32.mrb[71].mxu0 }
 0x2fc   :  { %1507 = vst [vmem:[%s3026_s6 + $0x10] sm:$0xff] %v1921_v31  ;;  %v1924_v36 = vadd.f32 %v1923_v35, %v1922_v32 }
 0x2fe   :  { %1508 = vst [vmem:[%s3026_s6 + $0x18] sm:$0xff] %v1924_v36 }
 0x300   :  { %v1925_v41 = vpop.f32.mrb[72].mxu0 }
 0x301   :  { %v1926_v42 = vpop.f32.mrb[73].mxu0 }
 0x302   :  { %v1927_v43 = vadd.f32 %v1926_v42, %v1925_v41  ;;  %v1928_v44 = vpop.f32.mrb[74].mxu0 }
 0x303   :  { %v1929_v45 = vpop.f32.mrb[75].mxu0 }
 0x304   :  { %1509 = vst [vmem:[%s3026_s6 + $0x20] sm:$0xff] %v1927_v43  ;;  %v1930_v46 = vadd.f32 %v1929_v45, %v1928_v44 }
 0x306   :  { %1510 = vst [vmem:[%s3026_s6 + $0x28] sm:$0xff] %v1930_v46 }
 0x308   :  { %v1931_v50 = vpop.f32.mrb[76].mxu0 }
 0x309   :  { %v1932_v24 = vpop.f32.mrb[77].mxu0 }
 0x30a   :  { %v1933_v51 = vadd.f32 %v1932_v24, %v1931_v50  ;;  %v1934_v34 = vpop.f32.mrb[78].mxu0 }
 0x30b   :  { %v1935_v52 = vpop.f32.mrb[79].mxu0 }
 0x30c   :  { %1511 = vst [vmem:[%s3026_s6 + $0x30] sm:$0xff] %v1933_v51  ;;  %v1936_v53 = vadd.f32 %v1935_v52, %v1934_v34 }
 0x30e   :  { %1512 = vst [vmem:[%s3026_s6 + $0x38] sm:$0xff] %v1936_v53 }
 0x310   :  { %v1937_v54 = vpop.f32.mrb[80].mxu0 }
 0x311   :  { %v1938_v58 = vpop.f32.mrb[81].mxu0 }
 0x312   :  { %v1939_v59 = vadd.f32 %v1938_v58, %v1937_v54  ;;  %v1940_v60 = vpop.f32.mrb[82].mxu0 }
 0x313   :  { %v1941_v23 = vpop.f32.mrb[83].mxu0 }
 0x314   :  { %1513 = vst [vmem:[%s3026_s6 + $0x40] sm:$0xff] %v1939_v59  ;;  %v1942_v61 = vadd.f32 %v1941_v23, %v1940_v60 }
 0x316   :  { %1514 = vst [vmem:[%s3026_s6 + $0x48] sm:$0xff] %v1942_v61 }
 0x318   :  { %v1943_v0 = vpop.f32.mrb[84].mxu0 }
 0x319   :  { %v1944_v1 = vpop.f32.mrb[85].mxu0 }
 0x31a   :  { %v1945_v49 = vadd.f32 %v1944_v1, %v1943_v0  ;;  %v1946_v2 = vpop.f32.mrb[86].mxu0 }
 0x31b   :  { %v1947_v3 = vpop.f32.mrb[87].mxu0 }
 0x31c   :  { %1515 = vst [vmem:[%s3026_s6 + $0x50] sm:$0xff] %v1945_v49  ;;  %v1948_v40 = vadd.f32 %v1947_v3, %v1946_v2 }
 0x31e   :  { %1516 = vst [vmem:[%s3026_s6 + $0x58] sm:$0xff] %v1948_v40 }
 0x320   :  { %v1949_v4 = vpop.f32.mrb[88].mxu0 }
 0x321   :  { %v1950_v5 = vpop.f32.mrb[89].mxu0 }
 0x322   :  { %v1951_v47 = vadd.f32 %v1950_v5, %v1949_v4  ;;  %v1952_v10 = vpop.f32.mrb[90].mxu0 }
 0x323   :  { %v1953_v11 = vpop.f32.mrb[91].mxu0 }
 0x324   :  { %1517 = vst [vmem:[%s3026_s6 + $0x60] sm:$0xff] %v1951_v47  ;;  %v1954_v14 = vadd.f32 %v1953_v11, %v1952_v10 }
 0x326   :  { %1518 = vst [vmem:[%s3026_s6 + $0x68] sm:$0xff] %v1954_v14 }
 0x328   :  { %v1955_v15 = vpop.f32.mrb[92].mxu0 }
 0x329   :  { %v1956_v63 = vpop.f32.mrb[93].mxu0 }
 0x32a   :  { %v1957_v38 = vadd.f32 %v1956_v63, %v1955_v15  ;;  %v1958_v16 = vpop.f32.mrb[94].mxu0 }
 0x32b   :  { %v1959_v17 = vpop.f32.mrb[95].mxu0 }
 0x32c   :  { %1519 = vst [vmem:[%s3026_s6 + $0x70] sm:$0xff] %v1957_v38  ;;  %v1960_v18 = vadd.f32 %v1959_v17, %v1958_v16 }
 0x32e   :  { %1520 = vst [vmem:[%s3026_s6 + $0x78] sm:$0xff] %v1960_v18 }
 0x330   :  { %v2013_v19 = vpop.f32.mrb[64].mxu1  ;;  %v1961_v62 = vpop.f32.mrb[96].mxu0 }
 0x331   :  { %v2014_v21 = vpop.f32.mrb[65].mxu1  ;;  %v1962_v57 = vpop.f32.mrb[97].mxu0 }
 0x332   :  { %v2015_v48 = vadd.f32 %v2014_v21, %v2013_v19  ;;  %v2016_v20 = vpop.f32.mrb[66].mxu1  ;;  %v1963_v33 = vadd.f32 %v1962_v57, %v1961_v62  ;;  %v1964_v9 = vpop.f32.mrb[98].mxu0 }
 0x333   :  { %v2017_v26 = vpop.f32.mrb[67].mxu1  ;;  %v1965_v22 = vpop.f32.mrb[99].mxu0 }
 0x334   :  { %1789 = vst [vmem:[%s3026_s6 + $0xe0] sm:$0xff] %v2015_v48  ;;  %v2018_v13 = vadd.f32 %v2017_v26, %v2016_v20  ;;  %1521 = vst [vmem:[%s3026_s6 + $0x80] sm:$0xff] %v1963_v33  ;;  %v1966_v37 = vadd.f32 %v1965_v22, %v1964_v9 }
 0x336   :  { %1790 = vst [vmem:[%s3026_s6 + $0xe8] sm:$0xff] %v2018_v13  ;;  %1522 = vst [vmem:[%s3026_s6 + $0x88] sm:$0xff] %v1966_v37 }
 0x338   :  { %v2019_v39 = vpop.f32.mrb[68].mxu1  ;;  %v1967_v55 = vpop.f32.mrb[100].mxu0 }
 0x339   :  { %v2020_v56 = vpop.f32.mrb[69].mxu1  ;;  %v1968_v6 = vpop.f32.mrb[101].mxu0 }
 0x33a   :  { %v2021_v7 = vadd.f32 %v2020_v56, %v2019_v39  ;;  %v2022_v8 = vpop.f32.mrb[70].mxu1  ;;  %v1969_v25 = vadd.f32 %v1968_v6, %v1967_v55  ;;  %v1970_v27 = vpop.f32.mrb[102].mxu0 }
 0x33b   :  { %v2023_v28 = vpop.f32.mrb[71].mxu1  ;;  %v1971_v29 = vpop.f32.mrb[103].mxu0 }
 0x33c   :  { %1791 = vst [vmem:[%s3026_s6 + $0xf0] sm:$0xff] %v2021_v7  ;;  %v2024_v30 = vadd.f32 %v2023_v28, %v2022_v8  ;;  %1523 = vst [vmem:[%s3026_s6 + $0x90] sm:$0xff] %v1969_v25  ;;  %v1972_v12 = vadd.f32 %v1971_v29, %v1970_v27 }
 0x33e   :  { %1792 = vst [vmem:[%s3026_s6 + $0xf8] sm:$0xff] %v2024_v30  ;;  %1524 = vst [vmem:[%s3026_s6 + $0x98] sm:$0xff] %v1972_v12 }
 0x340   :  { %v2025_v31 = vpop.f32.mrb[72].mxu1  ;;  %v1973_v32 = vpop.f32.mrb[104].mxu0 }
 0x341   :  { %v2026_v35 = vpop.f32.mrb[73].mxu1  ;;  %v1974_v36 = vpop.f32.mrb[105].mxu0 }
 0x342   :  { %v2027_v41 = vadd.f32 %v2026_v35, %v2025_v31  ;;  %v2028_v42 = vpop.f32.mrb[74].mxu1  ;;  %v1975_v43 = vadd.f32 %v1974_v36, %v1973_v32  ;;  %v1976_v44 = vpop.f32.mrb[106].mxu0 }
 0x343   :  { %v2029_v45 = vpop.f32.mrb[75].mxu1  ;;  %v1977_v46 = vpop.f32.mrb[107].mxu0 }
 0x344   :  { %1793 = vst [vmem:[%s3026_s6 + $0x100] sm:$0xff] %v2027_v41  ;;  %v2030_v50 = vadd.f32 %v2029_v45, %v2028_v42  ;;  %1525 = vst [vmem:[%s3026_s6 + $0xa0] sm:$0xff] %v1975_v43  ;;  %v1978_v24 = vadd.f32 %v1977_v46, %v1976_v44 }
 0x346   :  { %1794 = vst [vmem:[%s3026_s6 + $0x108] sm:$0xff] %v2030_v50  ;;  %1526 = vst [vmem:[%s3026_s6 + $0xa8] sm:$0xff] %v1978_v24 }
 0x348   :  { %v2031_v51 = vpop.f32.mrb[76].mxu1  ;;  %v1979_v34 = vpop.f32.mrb[108].mxu0 }
 0x349   :  { %v2032_v52 = vpop.f32.mrb[77].mxu1  ;;  %v1980_v53 = vpop.f32.mrb[109].mxu0 }
 0x34a   :  { %v2033_v54 = vadd.f32 %v2032_v52, %v2031_v51  ;;  %v2034_v58 = vpop.f32.mrb[78].mxu1  ;;  %v1981_v59 = vadd.f32 %v1980_v53, %v1979_v34  ;;  %v1982_v60 = vpop.f32.mrb[110].mxu0 }
 0x34b   :  { %v2035_v23 = vpop.f32.mrb[79].mxu1  ;;  %v1983_v61 = vpop.f32.mrb[111].mxu0 }
 0x34c   :  { %1795 = vst [vmem:[%s3026_s6 + $0x110] sm:$0xff] %v2033_v54  ;;  %v2036_v0 = vadd.f32 %v2035_v23, %v2034_v58  ;;  %1527 = vst [vmem:[%s3026_s6 + $0xb0] sm:$0xff] %v1981_v59  ;;  %v1984_v1 = vadd.f32 %v1983_v61, %v1982_v60 }
 0x34e   :  { %1796 = vst [vmem:[%s3026_s6 + $0x118] sm:$0xff] %v2036_v0  ;;  %1528 = vst [vmem:[%s3026_s6 + $0xb8] sm:$0xff] %v1984_v1 }
 0x350   :  { %v2037_v49 = vpop.f32.mrb[80].mxu1  ;;  %v1985_v2 = vpop.f32.mrb[112].mxu0 }
 0x351   :  { %v2038_v3 = vpop.f32.mrb[81].mxu1  ;;  %v1986_v40 = vpop.f32.mrb[113].mxu0 }
 0x352   :  { %v2039_v4 = vadd.f32 %v2038_v3, %v2037_v49  ;;  %v2040_v5 = vpop.f32.mrb[82].mxu1  ;;  %v1987_v47 = vadd.f32 %v1986_v40, %v1985_v2  ;;  %v1988_v10 = vpop.f32.mrb[114].mxu0 }
 0x353   :  { %v2041_v11 = vpop.f32.mrb[83].mxu1  ;;  %v1989_v14 = vpop.f32.mrb[115].mxu0 }
 0x354   :  { %1797 = vst [vmem:[%s3026_s6 + $0x120] sm:$0xff] %v2039_v4  ;;  %v2042_v15 = vadd.f32 %v2041_v11, %v2040_v5  ;;  %1529 = vst [vmem:[%s3026_s6 + $0xc0] sm:$0xff] %v1987_v47  ;;  %v1990_v63 = vadd.f32 %v1989_v14, %v1988_v10 }
 0x356   :  { %1798 = vst [vmem:[%s3026_s6 + $0x128] sm:$0xff] %v2042_v15  ;;  %1530 = vst [vmem:[%s3026_s6 + $0xc8] sm:$0xff] %v1990_v63 }
 0x358   :  { %v2043_v38 = vpop.f32.mrb[84].mxu1  ;;  %v1991_v16 = vpop.f32.mrb[116].mxu0 }
 0x359   :  { %v2044_v17 = vpop.f32.mrb[85].mxu1  ;;  %v1992_v18 = vpop.f32.mrb[117].mxu0 }
 0x35a   :  { %v2045_v19 = vadd.f32 %v2044_v17, %v2043_v38  ;;  %v2046_v62 = vpop.f32.mrb[86].mxu1  ;;  %v1993_v21 = vadd.f32 %v1992_v18, %v1991_v16  ;;  %v1994_v57 = vpop.f32.mrb[118].mxu0 }
 0x35b   :  { %v2047_v48 = vpop.f32.mrb[87].mxu1  ;;  %v1995_v20 = vpop.f32.mrb[119].mxu0 }
 0x35c   :  { %1799 = vst [vmem:[%s3026_s6 + $0x130] sm:$0xff] %v2045_v19  ;;  %v2048_v33 = vadd.f32 %v2047_v48, %v2046_v62  ;;  %1531 = vst [vmem:[%s3026_s6 + $0xd0] sm:$0xff] %v1993_v21  ;;  %v1996_v9 = vadd.f32 %v1995_v20, %v1994_v57 }
 0x35e   :  { %1800 = vst [vmem:[%s3026_s6 + $0x138] sm:$0xff] %v2048_v33  ;;  %1532 = vst [vmem:[%s3026_s6 + $0xd8] sm:$0xff] %v1996_v9 }
 0x360   :  { %v2049_v26 = vpop.f32.mrb[88].mxu1 }
 0x361   :  { %v2050_v22 = vpop.f32.mrb[89].mxu1 }
 0x362   :  { %v2051_v13 = vadd.f32 %v2050_v22, %v2049_v26  ;;  %v2052_v37 = vpop.f32.mrb[90].mxu1 }
 0x363   :  { %v2053_v39 = vpop.f32.mrb[91].mxu1 }
 0x364   :  { %1801 = vst [vmem:[%s3026_s6 + $0x140] sm:$0xff] %v2051_v13  ;;  %v2054_v55 = vadd.f32 %v2053_v39, %v2052_v37 }
 0x366   :  { %1802 = vst [vmem:[%s3026_s6 + $0x148] sm:$0xff] %v2054_v55 }
 0x368   :  { %v2055_v56 = vpop.f32.mrb[92].mxu1 }
 0x369   :  { %v2056_v6 = vpop.f32.mrb[93].mxu1 }
 0x36a   :  { %v2057_v7 = vadd.f32 %v2056_v6, %v2055_v56  ;;  %v2058_v8 = vpop.f32.mrb[94].mxu1 }
 0x36b   :  { %v2059_v25 = vpop.f32.mrb[95].mxu1 }
 0x36c   :  { %1803 = vst [vmem:[%s3026_s6 + $0x150] sm:$0xff] %v2057_v7  ;;  %v2060_v27 = vadd.f32 %v2059_v25, %v2058_v8 }
 0x36e   :  { %1804 = vst [vmem:[%s3026_s6 + $0x158] sm:$0xff] %v2060_v27 }
 0x370   :  { %v2061_v28 = vpop.f32.mrb[96].mxu1 }
 0x371   :  { %v2062_v29 = vpop.f32.mrb[97].mxu1 }
 0x372   :  { %v2063_v30 = vadd.f32 %v2062_v29, %v2061_v28  ;;  %v2064_v12 = vpop.f32.mrb[98].mxu1 }
 0x373   :  { %v2065_v31 = vpop.f32.mrb[99].mxu1 }
 0x374   :  { %1805 = vst [vmem:[%s3026_s6 + $0x160] sm:$0xff] %v2063_v30  ;;  %v2066_v32 = vadd.f32 %v2065_v31, %v2064_v12 }
 0x376   :  { %1806 = vst [vmem:[%s3026_s6 + $0x168] sm:$0xff] %v2066_v32 }
 0x378   :  { %v2067_v35 = vpop.f32.mrb[100].mxu1 }
 0x379   :  { %v2068_v36 = vpop.f32.mrb[101].mxu1 }
 0x37a   :  { %v2069_v41 = vadd.f32 %v2068_v36, %v2067_v35  ;;  %v2070_v42 = vpop.f32.mrb[102].mxu1 }
 0x37b   :  { %v2071_v43 = vpop.f32.mrb[103].mxu1 }
 0x37c   :  { %1807 = vst [vmem:[%s3026_s6 + $0x170] sm:$0xff] %v2069_v41  ;;  %v2072_v44 = vadd.f32 %v2071_v43, %v2070_v42 }
 0x37e   :  { %1808 = vst [vmem:[%s3026_s6 + $0x178] sm:$0xff] %v2072_v44 }
 0x380   :  { %v2073_v45 = vpop.f32.mrb[104].mxu1 }
 0x381   :  { %v2074_v46 = vpop.f32.mrb[105].mxu1 }
 0x382   :  { %v2075_v50 = vadd.f32 %v2074_v46, %v2073_v45  ;;  %v2076_v24 = vpop.f32.mrb[106].mxu1 }
 0x383   :  { %v2077_v51 = vpop.f32.mrb[107].mxu1 }
 0x384   :  { %1809 = vst [vmem:[%s3026_s6 + $0x180] sm:$0xff] %v2075_v50  ;;  %v2078_v34 = vadd.f32 %v2077_v51, %v2076_v24 }
 0x386   :  { %1810 = vst [vmem:[%s3026_s6 + $0x188] sm:$0xff] %v2078_v34 }
 0x388   :  { %v2079_v52 = vpop.f32.mrb[108].mxu1 }
 0x389   :  { %v2080_v53 = vpop.f32.mrb[109].mxu1 }
 0x38a   :  { %v2081_v54 = vadd.f32 %v2080_v53, %v2079_v52  ;;  %v2082_v58 = vpop.f32.mrb[110].mxu1 }
 0x38b   :  { %v2083_v59 = vpop.f32.mrb[111].mxu1 }
 0x38c   :  { %1811 = vst [vmem:[%s3026_s6 + $0x190] sm:$0xff] %v2081_v54  ;;  %v2084_v60 = vadd.f32 %v2083_v59, %v2082_v58 }
 0x38e   :  { %1812 = vst [vmem:[%s3026_s6 + $0x198] sm:$0xff] %v2084_v60 }
 0x390   :  { %v2085_v23 = vpop.f32.mrb[112].mxu1 }
 0x391   :  { %v2086_v61 = vpop.f32.mrb[113].mxu1 }
 0x392   :  { %v2087_v0 = vadd.f32 %v2086_v61, %v2085_v23  ;;  %v2088_v1 = vpop.f32.mrb[114].mxu1 }
 0x393   :  { %v2089_v49 = vpop.f32.mrb[115].mxu1 }
 0x394   :  { %1813 = vst [vmem:[%s3026_s6 + $0x1a0] sm:$0xff] %v2087_v0  ;;  %v2090_v2 = vadd.f32 %v2089_v49, %v2088_v1 }
 0x396   :  { %1814 = vst [vmem:[%s3026_s6 + $0x1a8] sm:$0xff] %v2090_v2 }
 0x398   :  { %v2091_v3 = vpop.f32.mrb[116].mxu1 }
 0x399   :  { %v2092_v40 = vpop.f32.mrb[117].mxu1 }
 0x39a   :  { %v2093_v4 = vadd.f32 %v2092_v40, %v2091_v3  ;;  %v2094_v5 = vpop.f32.mrb[118].mxu1 }
 0x39b   :  { %v2095_v47 = vpop.f32.mrb[119].mxu1 }
 0x39c   :  { %1815 = vst [vmem:[%s3026_s6 + $0x1b0] sm:$0xff] %v2093_v4  ;;  %v2096_v10 = vadd.f32 %v2095_v47, %v2094_v5 }
 0x39e   :  { %1816 = vst [vmem:[%s3026_s6 + $0x1b8] sm:$0xff] %v2096_v10 }

</bundles_post_ra>
